<compile_context>
chip_gen: v5e
topology: v5e:2x2
jax: 0.10.0
libtpu: 0.0.40
codegen_flags: <defaults>
</compile_context>

<pallas_src>
import functools

import jax
import jax.numpy as jnp
from jax import lax
from jax.experimental import pallas as pl
from jax.experimental.pallas import tpu as pltpu


# ----------------------------- Pallas kernel --------------------------------

def _fused_kernel(enc_pat_ref, w_enc_t_ref, b_enc_ref, w_dec_t_ref, b_dec_ref,
                  mask_ref, out_ref, *, img_w):
    """Encoder conv+ReLU (both inputs), fusion average, decoder conv+bias.

    enc_pat_ref : (9*Cin, 2*M) f32   im2col'd [vi | ir] patches, M = N*H*W
    w_enc_t_ref : (Ch, 9*Cin)  f32   encoder weight, transposed
    b_enc_ref   : (Ch, 1)      f32
    w_dec_t_ref : (9, Cout, Ch) f32  decoder weight per tap, transposed
    b_dec_ref   : (Cout, 1)    f32
    mask_ref    : (9, 1, M)    f32   per-tap boundary masks (SAME zero pad)
    out_ref     : (N, Cout, H*W) f32 lane-dense, NCHW-ordered output
    """
    n_b, cout, hw = out_ref.shape
    m = n_b * hw

    # ---- encoder: one stacked MXU matmul for vi and ir, bias + ReLU --------
    enc = jnp.dot(w_enc_t_ref[...], enc_pat_ref[...],
                  preferred_element_type=jnp.float32)          # (Ch, 2M)
    enc = jnp.maximum(enc + b_enc_ref[...], 0.0)

    # ---- fusion: average of the vi / ir halves (lane slices, 128-aligned) --
    fused = (enc[:, :m] + enc[:, m:]) * 0.5                     # (Ch, M)

    # ---- decoder 3x3 SAME conv: 9 accumulating dots on rolled latent -------
    acc = jnp.zeros((cout, m), dtype=jnp.float32)
    for dy in range(3):
        for dx in range(3):
            t = dy * 3 + dx
            off = (dy - 1) * img_w + (dx - 1)     # flattened spatial offset
            if off == 0:
                tap = fused
            else:
                # tap[:, p] = fused[:, p + off]   (np.roll convention)
                tap = pltpu.roll(fused, shift=(-off) % m, axis=1)
                tap = tap * mask_ref[t]           # zero out-of-image taps
            acc = acc + jnp.dot(w_dec_t_ref[t], tap,
                                preferred_element_type=jnp.float32)
    dec = acc + b_dec_ref[...]                                  # (Cout, M)

    # ---- lane-dense store, already NCHW-ordered per batch ------------------
    for nb in range(n_b):
        out_ref[nb] = dec[:, nb * hw:(nb + 1) * hw]


# ----------------------------- Wrapper glue ----------------------------------

def _im2col_t_3x3_same_nchw(x_nchw):
    """(N, C, H, W) -> (9*C, N*H*W); rows ordered (tap=(dy,dx) major, then c)."""
    n, c, h, w = x_nchw.shape
    xp = jnp.pad(x_nchw, ((0, 0), (0, 0), (1, 1), (1, 1)))
    taps = [xp[:, :, dy:dy + h, dx:dx + w]
            for dy in range(3) for dx in range(3)]              # each (N,C,H,W)
    pt = jnp.stack(taps, axis=0)                                # (9,N,C,H,W)
    pt = jnp.transpose(pt, (0, 2, 1, 3, 4))                     # (9,C,N,H,W)
    return pt.reshape(9 * c, n * h * w)


def _decoder_boundary_masks(n, h, w):
    """(9, 1, N*H*W) f32 masks implementing SAME zero padding per 3x3 tap."""
    pos = jnp.arange(n * h * w, dtype=jnp.int32)
    y = (pos // w) % h
    x = pos % w
    masks = []
    for dy in range(3):
        for dx in range(3):
            ok = ((y + dy - 1 >= 0) & (y + dy - 1 < h)
                  & (x + dx - 1 >= 0) & (x + dx - 1 < w))
            masks.append(ok.astype(jnp.float32))
    return jnp.stack(masks, axis=0).reshape(9, 1, n * h * w)


@jax.jit
def connect_model_decoder4(vi_nchw, ir_nchw, params):
    """Full forward pass.  vi/ir: (N, Cin, H, W) f32.  Returns (N, Cout, H, W)."""
    w_enc, b_enc, w_dec, b_dec = params            # w_*: (3,3,Cin,Cout) HWIO
    n, cin, h, w = vi_nchw.shape
    ch = w_enc.shape[-1]
    cout = w_dec.shape[-1]
    m = n * h * w
    hw = h * w

    # cheap XLA-side glue: transposed im2col of the raw inputs, weight/bias
    # re-layouts, and static boundary masks.
    vi_pt = _im2col_t_3x3_same_nchw(vi_nchw)                    # (9*Cin, M)
    ir_pt = _im2col_t_3x3_same_nchw(ir_nchw)
    enc_pat = jnp.concatenate([vi_pt, ir_pt], axis=1)           # (9*Cin, 2M)

    w_enc_t = w_enc.reshape(9 * cin, ch).T                      # (Ch, 9*Cin)
    w_dec_t = jnp.transpose(w_dec.reshape(9, ch, cout), (0, 2, 1))  # (9,Cout,Ch)
    b_enc_c = b_enc.reshape(ch, 1)
    b_dec_c = b_dec.reshape(cout, 1)
    dec_mask = _decoder_boundary_masks(n, h, w)                 # (9, 1, M)

    kernel = functools.partial(_fused_kernel, img_w=w)

    out = pl.pallas_call(
        kernel,
        out_shape=jax.ShapeDtypeStruct((n, cout, hw), jnp.float32),
        grid_spec=pltpu.PrefetchScalarGridSpec(
            num_scalar_prefetch=0,
            grid=(1,),
            in_specs=[
                pl.BlockSpec((9 * cin, 2 * m), lambda i: (0, 0)),
                pl.BlockSpec((ch, 9 * cin), lambda i: (0, 0)),
                pl.BlockSpec((ch, 1), lambda i: (0, 0)),
                pl.BlockSpec((9, cout, ch), lambda i: (0, 0, 0)),
                pl.BlockSpec((cout, 1), lambda i: (0, 0)),
                pl.BlockSpec((9, 1, m), lambda i: (0, 0, 0)),
            ],
            out_specs=pl.BlockSpec((n, cout, hw), lambda i: (0, 0, 0)),
        ),
        compiler_params=pltpu.CompilerParams(
            dimension_semantics=("arbitrary",)),
    )(enc_pat, w_enc_t, b_enc_c, w_dec_t, b_dec_c, dec_mask)

    # (N, Cout, H*W) is already NCHW-ordered; only a free reshape remains.
    return out.reshape(n, cout, h, w)


# ----------------------------- Reference (pure JAX) --------------------------

def _conv3x3_same_ref(x_nhwc, w_hwio, b):
    y = lax.conv_general_dilated(
        x_nhwc, w_hwio, window_strides=(1, 1), padding="SAME",
        dimension_numbers=("NHWC", "HWIO", "NHWC"))
    return y + b[None, None, None, :]


def connect_model_decoder4_ref(vi_nchw, ir_nchw, params):
    w_enc, b_enc, w_dec, b_dec = params
    vi = jnp.transpose(vi_nchw, (0, 2, 3, 1))
    ir = jnp.transpose(ir_nchw, (0, 2, 3, 1))
    vi_lat = jnp.maximum(_conv3x3_same_ref(vi, w_enc, b_enc), 0.0)
    ir_lat = jnp.maximum(_conv3x3_same_ref(ir, w_enc, b_enc), 0.0)
    fused = (vi_lat + ir_lat) / 2.0
    out = _conv3x3_same_ref(fused, w_dec, b_dec)
    return jnp.transpose(out, (0, 3, 1, 2))


# ----------------------------- Main ------------------------------------------

if __name__ == "__main__":
    N, Cin, H, W = 2, 4, 16, 16
    Ch, Cout = 32, 4

    key = jax.random.PRNGKey(0)
    k1, k2, k3, k4, k5, k6 = jax.random.split(key, 6)

    vi = jax.random.normal(k1, (N, Cin, H, W), dtype=jnp.float32)
    ir = jax.random.normal(k2, (N, Cin, H, W), dtype=jnp.float32)

    # deterministic synthetic weights (HWIO layout for conv)
    w_enc = 0.1 * jax.random.normal(k3, (3, 3, Cin, Ch), dtype=jnp.float32)
    b_enc = 0.01 * jax.random.normal(k4, (Ch,), dtype=jnp.float32)
    w_dec = 0.1 * jax.random.normal(k5, (3, 3, Ch, Cout), dtype=jnp.float32)
    b_dec = 0.01 * jax.random.normal(k6, (Cout,), dtype=jnp.float32)
    params = (w_enc, b_enc, w_dec, b_dec)

    out = connect_model_decoder4(vi, ir, params)
    out = jax.block_until_ready(out)

    ref = jax.block_until_ready(connect_model_decoder4_ref(vi, ir, params))
    assert out.shape == (N, Cout, H, W)
    assert jnp.allclose(out, ref, rtol=1e-3, atol=1e-3), "mismatch vs JAX reference"

    print("KERNEL_OK")
</pallas_src>

<mosaic_0001>
module attributes {stable_mosaic.version = 11 : i64} {
  func.func @_fused_kernel(%arg0: i32, %arg1: memref<36x1024xf32, #tpu.memory_space<vmem>>, %arg2: memref<32x36xf32, #tpu.memory_space<vmem>>, %arg3: memref<32x1xf32, #tpu.memory_space<vmem>>, %arg4: memref<9x4x32xf32, #tpu.memory_space<vmem>>, %arg5: memref<4x1xf32, #tpu.memory_space<vmem>>, %arg6: memref<9x1x512xf32, #tpu.memory_space<vmem>>, %arg7: memref<2x4x256xf32, #tpu.memory_space<vmem>>) attributes {dimension_semantics = [#tpu.dimension_semantics<arbitrary>], iteration_bounds = array<i64: 1>, scalar_prefetch = 0 : i64, scratch_operands = 0 : i64, tpu.core_type = #tpu.core_type<tc>, window_params = [{pipeline_mode = #tpu.pipeline_mode<synchronous>, transform_indices = @transform_0, window_bounds = array<i64: 36, 1024>}, {pipeline_mode = #tpu.pipeline_mode<synchronous>, transform_indices = @transform_1, window_bounds = array<i64: 32, 36>}, {pipeline_mode = #tpu.pipeline_mode<synchronous>, transform_indices = @transform_2, window_bounds = array<i64: 32, 1>}, {pipeline_mode = #tpu.pipeline_mode<synchronous>, transform_indices = @transform_3, window_bounds = array<i64: 9, 4, 32>}, {pipeline_mode = #tpu.pipeline_mode<synchronous>, transform_indices = @transform_4, window_bounds = array<i64: 4, 1>}, {pipeline_mode = #tpu.pipeline_mode<synchronous>, transform_indices = @transform_5, window_bounds = array<i64: 9, 1, 512>}, {pipeline_mode = #tpu.pipeline_mode<synchronous>, transform_indices = @transform_6, window_bounds = array<i64: 2, 4, 256>}]} {
    %c0 = arith.constant 0 : index
    %c0_0 = arith.constant 0 : index
    %0 = vector.load %arg2[%c0, %c0_0] : memref<32x36xf32, #tpu.memory_space<vmem>>, vector<32x36xf32>
    %c0_1 = arith.constant 0 : index
    %c0_2 = arith.constant 0 : index
    %1 = vector.load %arg1[%c0_1, %c0_2] : memref<36x1024xf32, #tpu.memory_space<vmem>>, vector<36x1024xf32>
    %cst = arith.constant dense<0.000000e+00> : vector<32x1024xf32>
    %2 = tpu.matmul %0, %1, %cst {dimension_numbers = #tpu.dot_dimension_numbers<[1], [0], [0], [1], [0, 0, 1, 1], [], []>} : vector<32x36xf32>, vector<36x1024xf32>, vector<32x1024xf32> -> vector<32x1024xf32>
    %c0_3 = arith.constant 0 : index
    %c0_4 = arith.constant 0 : index
    %3 = vector.load %arg3[%c0_3, %c0_4] : memref<32x1xf32, #tpu.memory_space<vmem>>, vector<32x1xf32>
    %4 = vector.broadcast %3 : vector<32x1xf32> to vector<32x1024xf32>
    %5 = arith.addf %2, %4 : vector<32x1024xf32>
    %cst_5 = arith.constant 0.000000e+00 : f32
    %6 = vector.broadcast %cst_5 : f32 to vector<32x1024xf32>
    %7 = arith.maximumf %5, %6 : vector<32x1024xf32>
    %8 = vector.extract_strided_slice %7 {offsets = [0, 0], sizes = [32, 512], strides = [1, 1]} : vector<32x1024xf32> to vector<32x512xf32>
    %9 = vector.extract_strided_slice %7 {offsets = [0, 512], sizes = [32, 512], strides = [1, 1]} : vector<32x1024xf32> to vector<32x512xf32>
    %10 = arith.addf %8, %9 : vector<32x512xf32>
    %cst_6 = arith.constant 5.000000e-01 : f32
    %11 = vector.broadcast %cst_6 : f32 to vector<32x512xf32>
    %12 = arith.mulf %10, %11 : vector<32x512xf32>
    %cst_7 = arith.constant 0.000000e+00 : f32
    %13 = vector.broadcast %cst_7 : f32 to vector<4x512xf32>
    %c17_i32 = arith.constant 17 : i32
    %14 = tpu.dynamic_rotate %12 by %c17_i32 dim 1 : vector<32x512xf32>, i32 -> vector<32x512xf32>
    %c0_8 = arith.constant 0 : index
    %c0_9 = arith.constant 0 : index
    %c0_10 = arith.constant 0 : index
    %15 = vector.load %arg6[%c0_8, %c0_9, %c0_10] : memref<9x1x512xf32, #tpu.memory_space<vmem>>, vector<1x1x512xf32>
    %16 = vector.shape_cast %15 : vector<1x1x512xf32> to vector<1x512xf32>
    %17 = vector.broadcast %16 : vector<1x512xf32> to vector<32x512xf32>
    %18 = arith.mulf %14, %17 : vector<32x512xf32>
    %c0_11 = arith.constant 0 : index
    %c0_12 = arith.constant 0 : index
    %c0_13 = arith.constant 0 : index
    %19 = vector.load %arg4[%c0_11, %c0_12, %c0_13] : memref<9x4x32xf32, #tpu.memory_space<vmem>>, vector<1x4x32xf32>
    %20 = vector.shape_cast %19 : vector<1x4x32xf32> to vector<4x32xf32>
    %cst_14 = arith.constant dense<0.000000e+00> : vector<4x512xf32>
    %21 = tpu.matmul %20, %18, %cst_14 {dimension_numbers = #tpu.dot_dimension_numbers<[1], [0], [0], [1], [0, 0, 1, 1], [], []>} : vector<4x32xf32>, vector<32x512xf32>, vector<4x512xf32> -> vector<4x512xf32>
    %22 = arith.addf %13, %21 : vector<4x512xf32>
    %c16_i32 = arith.constant 16 : i32
    %23 = tpu.dynamic_rotate %12 by %c16_i32 dim 1 : vector<32x512xf32>, i32 -> vector<32x512xf32>
    %c1 = arith.constant 1 : index
    %c0_15 = arith.constant 0 : index
    %c0_16 = arith.constant 0 : index
    %24 = vector.load %arg6[%c1, %c0_15, %c0_16] : memref<9x1x512xf32, #tpu.memory_space<vmem>>, vector<1x1x512xf32>
    %25 = vector.shape_cast %24 : vector<1x1x512xf32> to vector<1x512xf32>
    %26 = vector.broadcast %25 : vector<1x512xf32> to vector<32x512xf32>
    %27 = arith.mulf %23, %26 : vector<32x512xf32>
    %c1_17 = arith.constant 1 : index
    %c0_18 = arith.constant 0 : index
    %c0_19 = arith.constant 0 : index
    %28 = vector.load %arg4[%c1_17, %c0_18, %c0_19] : memref<9x4x32xf32, #tpu.memory_space<vmem>>, vector<1x4x32xf32>
    %29 = vector.shape_cast %28 : vector<1x4x32xf32> to vector<4x32xf32>
    %cst_20 = arith.constant dense<0.000000e+00> : vector<4x512xf32>
    %30 = tpu.matmul %29, %27, %cst_20 {dimension_numbers = #tpu.dot_dimension_numbers<[1], [0], [0], [1], [0, 0, 1, 1], [], []>} : vector<4x32xf32>, vector<32x512xf32>, vector<4x512xf32> -> vector<4x512xf32>
    %31 = arith.addf %22, %30 : vector<4x512xf32>
    %c15_i32 = arith.constant 15 : i32
    %32 = tpu.dynamic_rotate %12 by %c15_i32 dim 1 : vector<32x512xf32>, i32 -> vector<32x512xf32>
    %c2 = arith.constant 2 : index
    %c0_21 = arith.constant 0 : index
    %c0_22 = arith.constant 0 : index
    %33 = vector.load %arg6[%c2, %c0_21, %c0_22] : memref<9x1x512xf32, #tpu.memory_space<vmem>>, vector<1x1x512xf32>
    %34 = vector.shape_cast %33 : vector<1x1x512xf32> to vector<1x512xf32>
    %35 = vector.broadcast %34 : vector<1x512xf32> to vector<32x512xf32>
    %36 = arith.mulf %32, %35 : vector<32x512xf32>
    %c2_23 = arith.constant 2 : index
    %c0_24 = arith.constant 0 : index
    %c0_25 = arith.constant 0 : index
    %37 = vector.load %arg4[%c2_23, %c0_24, %c0_25] : memref<9x4x32xf32, #tpu.memory_space<vmem>>, vector<1x4x32xf32>
    %38 = vector.shape_cast %37 : vector<1x4x32xf32> to vector<4x32xf32>
    %cst_26 = arith.constant dense<0.000000e+00> : vector<4x512xf32>
    %39 = tpu.matmul %38, %36, %cst_26 {dimension_numbers = #tpu.dot_dimension_numbers<[1], [0], [0], [1], [0, 0, 1, 1], [], []>} : vector<4x32xf32>, vector<32x512xf32>, vector<4x512xf32> -> vector<4x512xf32>
    %40 = arith.addf %31, %39 : vector<4x512xf32>
    %c1_i32 = arith.constant 1 : i32
    %41 = tpu.dynamic_rotate %12 by %c1_i32 dim 1 : vector<32x512xf32>, i32 -> vector<32x512xf32>
    %c3 = arith.constant 3 : index
    %c0_27 = arith.constant 0 : index
    %c0_28 = arith.constant 0 : index
    %42 = vector.load %arg6[%c3, %c0_27, %c0_28] : memref<9x1x512xf32, #tpu.memory_space<vmem>>, vector<1x1x512xf32>
    %43 = vector.shape_cast %42 : vector<1x1x512xf32> to vector<1x512xf32>
    %44 = vector.broadcast %43 : vector<1x512xf32> to vector<32x512xf32>
    %45 = arith.mulf %41, %44 : vector<32x512xf32>
    %c3_29 = arith.constant 3 : index
    %c0_30 = arith.constant 0 : index
    %c0_31 = arith.constant 0 : index
    %46 = vector.load %arg4[%c3_29, %c0_30, %c0_31] : memref<9x4x32xf32, #tpu.memory_space<vmem>>, vector<1x4x32xf32>
    %47 = vector.shape_cast %46 : vector<1x4x32xf32> to vector<4x32xf32>
    %cst_32 = arith.constant dense<0.000000e+00> : vector<4x512xf32>
    %48 = tpu.matmul %47, %45, %cst_32 {dimension_numbers = #tpu.dot_dimension_numbers<[1], [0], [0], [1], [0, 0, 1, 1], [], []>} : vector<4x32xf32>, vector<32x512xf32>, vector<4x512xf32> -> vector<4x512xf32>
    %49 = arith.addf %40, %48 : vector<4x512xf32>
    %c4 = arith.constant 4 : index
    %c0_33 = arith.constant 0 : index
    %c0_34 = arith.constant 0 : index
    %50 = vector.load %arg4[%c4, %c0_33, %c0_34] : memref<9x4x32xf32, #tpu.memory_space<vmem>>, vector<1x4x32xf32>
    %51 = vector.shape_cast %50 : vector<1x4x32xf32> to vector<4x32xf32>
    %cst_35 = arith.constant dense<0.000000e+00> : vector<4x512xf32>
    %52 = tpu.matmul %51, %12, %cst_35 {dimension_numbers = #tpu.dot_dimension_numbers<[1], [0], [0], [1], [0, 0, 1, 1], [], []>} : vector<4x32xf32>, vector<32x512xf32>, vector<4x512xf32> -> vector<4x512xf32>
    %53 = arith.addf %49, %52 : vector<4x512xf32>
    %c511_i32 = arith.constant 511 : i32
    %54 = tpu.dynamic_rotate %12 by %c511_i32 dim 1 : vector<32x512xf32>, i32 -> vector<32x512xf32>
    %c5 = arith.constant 5 : index
    %c0_36 = arith.constant 0 : index
    %c0_37 = arith.constant 0 : index
    %55 = vector.load %arg6[%c5, %c0_36, %c0_37] : memref<9x1x512xf32, #tpu.memory_space<vmem>>, vector<1x1x512xf32>
    %56 = vector.shape_cast %55 : vector<1x1x512xf32> to vector<1x512xf32>
    %57 = vector.broadcast %56 : vector<1x512xf32> to vector<32x512xf32>
    %58 = arith.mulf %54, %57 : vector<32x512xf32>
    %c5_38 = arith.constant 5 : index
    %c0_39 = arith.constant 0 : index
    %c0_40 = arith.constant 0 : index
    %59 = vector.load %arg4[%c5_38, %c0_39, %c0_40] : memref<9x4x32xf32, #tpu.memory_space<vmem>>, vector<1x4x32xf32>
    %60 = vector.shape_cast %59 : vector<1x4x32xf32> to vector<4x32xf32>
    %cst_41 = arith.constant dense<0.000000e+00> : vector<4x512xf32>
    %61 = tpu.matmul %60, %58, %cst_41 {dimension_numbers = #tpu.dot_dimension_numbers<[1], [0], [0], [1], [0, 0, 1, 1], [], []>} : vector<4x32xf32>, vector<32x512xf32>, vector<4x512xf32> -> vector<4x512xf32>
    %62 = arith.addf %53, %61 : vector<4x512xf32>
    %c497_i32 = arith.constant 497 : i32
    %63 = tpu.dynamic_rotate %12 by %c497_i32 dim 1 : vector<32x512xf32>, i32 -> vector<32x512xf32>
    %c6 = arith.constant 6 : index
    %c0_42 = arith.constant 0 : index
    %c0_43 = arith.constant 0 : index
    %64 = vector.load %arg6[%c6, %c0_42, %c0_43] : memref<9x1x512xf32, #tpu.memory_space<vmem>>, vector<1x1x512xf32>
    %65 = vector.shape_cast %64 : vector<1x1x512xf32> to vector<1x512xf32>
    %66 = vector.broadcast %65 : vector<1x512xf32> to vector<32x512xf32>
    %67 = arith.mulf %63, %66 : vector<32x512xf32>
    %c6_44 = arith.constant 6 : index
    %c0_45 = arith.constant 0 : index
    %c0_46 = arith.constant 0 : index
    %68 = vector.load %arg4[%c6_44, %c0_45, %c0_46] : memref<9x4x32xf32, #tpu.memory_space<vmem>>, vector<1x4x32xf32>
    %69 = vector.shape_cast %68 : vector<1x4x32xf32> to vector<4x32xf32>
    %cst_47 = arith.constant dense<0.000000e+00> : vector<4x512xf32>
    %70 = tpu.matmul %69, %67, %cst_47 {dimension_numbers = #tpu.dot_dimension_numbers<[1], [0], [0], [1], [0, 0, 1, 1], [], []>} : vector<4x32xf32>, vector<32x512xf32>, vector<4x512xf32> -> vector<4x512xf32>
    %71 = arith.addf %62, %70 : vector<4x512xf32>
    %c496_i32 = arith.constant 496 : i32
    %72 = tpu.dynamic_rotate %12 by %c496_i32 dim 1 : vector<32x512xf32>, i32 -> vector<32x512xf32>
    %c7 = arith.constant 7 : index
    %c0_48 = arith.constant 0 : index
    %c0_49 = arith.constant 0 : index
    %73 = vector.load %arg6[%c7, %c0_48, %c0_49] : memref<9x1x512xf32, #tpu.memory_space<vmem>>, vector<1x1x512xf32>
    %74 = vector.shape_cast %73 : vector<1x1x512xf32> to vector<1x512xf32>
    %75 = vector.broadcast %74 : vector<1x512xf32> to vector<32x512xf32>
    %76 = arith.mulf %72, %75 : vector<32x512xf32>
    %c7_50 = arith.constant 7 : index
    %c0_51 = arith.constant 0 : index
    %c0_52 = arith.constant 0 : index
    %77 = vector.load %arg4[%c7_50, %c0_51, %c0_52] : memref<9x4x32xf32, #tpu.memory_space<vmem>>, vector<1x4x32xf32>
    %78 = vector.shape_cast %77 : vector<1x4x32xf32> to vector<4x32xf32>
    %cst_53 = arith.constant dense<0.000000e+00> : vector<4x512xf32>
    %79 = tpu.matmul %78, %76, %cst_53 {dimension_numbers = #tpu.dot_dimension_numbers<[1], [0], [0], [1], [0, 0, 1, 1], [], []>} : vector<4x32xf32>, vector<32x512xf32>, vector<4x512xf32> -> vector<4x512xf32>
    %80 = arith.addf %71, %79 : vector<4x512xf32>
    %c495_i32 = arith.constant 495 : i32
    %81 = tpu.dynamic_rotate %12 by %c495_i32 dim 1 : vector<32x512xf32>, i32 -> vector<32x512xf32>
    %c8 = arith.constant 8 : index
    %c0_54 = arith.constant 0 : index
    %c0_55 = arith.constant 0 : index
    %82 = vector.load %arg6[%c8, %c0_54, %c0_55] : memref<9x1x512xf32, #tpu.memory_space<vmem>>, vector<1x1x512xf32>
    %83 = vector.shape_cast %82 : vector<1x1x512xf32> to vector<1x512xf32>
    %84 = vector.broadcast %83 : vector<1x512xf32> to vector<32x512xf32>
    %85 = arith.mulf %81, %84 : vector<32x512xf32>
    %c8_56 = arith.constant 8 : index
    %c0_57 = arith.constant 0 : index
    %c0_58 = arith.constant 0 : index
    %86 = vector.load %arg4[%c8_56, %c0_57, %c0_58] : memref<9x4x32xf32, #tpu.memory_space<vmem>>, vector<1x4x32xf32>
    %87 = vector.shape_cast %86 : vector<1x4x32xf32> to vector<4x32xf32>
    %cst_59 = arith.constant dense<0.000000e+00> : vector<4x512xf32>
    %88 = tpu.matmul %87, %85, %cst_59 {dimension_numbers = #tpu.dot_dimension_numbers<[1], [0], [0], [1], [0, 0, 1, 1], [], []>} : vector<4x32xf32>, vector<32x512xf32>, vector<4x512xf32> -> vector<4x512xf32>
    %89 = arith.addf %80, %88 : vector<4x512xf32>
    %c0_60 = arith.constant 0 : index
    %c0_61 = arith.constant 0 : index
    %90 = vector.load %arg5[%c0_60, %c0_61] : memref<4x1xf32, #tpu.memory_space<vmem>>, vector<4x1xf32>
    %91 = vector.broadcast %90 : vector<4x1xf32> to vector<4x512xf32>
    %92 = arith.addf %89, %91 : vector<4x512xf32>
    %93 = vector.extract_strided_slice %92 {offsets = [0, 0], sizes = [4, 256], strides = [1, 1]} : vector<4x512xf32> to vector<4x256xf32>
    %c0_62 = arith.constant 0 : index
    %c0_63 = arith.constant 0 : index
    %c0_64 = arith.constant 0 : index
    %94 = vector.load %arg7[%c0_62, %c0_63, %c0_64] : memref<2x4x256xf32, #tpu.memory_space<vmem>>, vector<1x4x256xf32>
    %95 = vector.shape_cast %94 : vector<1x4x256xf32> to vector<4x256xf32>
    %96 = vector.shape_cast %93 : vector<4x256xf32> to vector<1x4x256xf32>
    tpu.vector_store %arg7[%c0_62, %c0_63, %c0_64], %96 {strides = array<i32>} : memref<2x4x256xf32, #tpu.memory_space<vmem>>, vector<1x4x256xf32>,
    %97 = vector.extract_strided_slice %92 {offsets = [0, 256], sizes = [4, 256], strides = [1, 1]} : vector<4x512xf32> to vector<4x256xf32>
    %c1_65 = arith.constant 1 : index
    %c0_66 = arith.constant 0 : index
    %c0_67 = arith.constant 0 : index
    %98 = vector.load %arg7[%c1_65, %c0_66, %c0_67] : memref<2x4x256xf32, #tpu.memory_space<vmem>>, vector<1x4x256xf32>
    %99 = vector.shape_cast %98 : vector<1x4x256xf32> to vector<4x256xf32>
    %100 = vector.shape_cast %97 : vector<4x256xf32> to vector<1x4x256xf32>
    tpu.vector_store %arg7[%c1_65, %c0_66, %c0_67], %100 {strides = array<i32>} : memref<2x4x256xf32, #tpu.memory_space<vmem>>, vector<1x4x256xf32>,
    return
  }
  func.func @transform_0(%arg0: i32) -> (i32, i32) {
    %c0_i32 = arith.constant 0 : i32
    %c0_i32_0 = arith.constant 0 : i32
    %c0_i32_1 = arith.constant 0 : i32
    return %c0_i32, %c0_i32_0 : i32, i32
  }
  func.func @transform_1(%arg0: i32) -> (i32, i32) {
    %c0_i32 = arith.constant 0 : i32
    %c0_i32_0 = arith.constant 0 : i32
    %c0_i32_1 = arith.constant 0 : i32
    return %c0_i32, %c0_i32_0 : i32, i32
  }
  func.func @transform_2(%arg0: i32) -> (i32, i32) {
    %c0_i32 = arith.constant 0 : i32
    %c0_i32_0 = arith.constant 0 : i32
    %c0_i32_1 = arith.constant 0 : i32
    return %c0_i32, %c0_i32_0 : i32, i32
  }
  func.func @transform_3(%arg0: i32) -> (i32, i32, i32) {
    %c0_i32 = arith.constant 0 : i32
    %c0_i32_0 = arith.constant 0 : i32
    %c0_i32_1 = arith.constant 0 : i32
    %c0_i32_2 = arith.constant 0 : i32
    return %c0_i32, %c0_i32_0, %c0_i32_1 : i32, i32, i32
  }
  func.func @transform_4(%arg0: i32) -> (i32, i32) {
    %c0_i32 = arith.constant 0 : i32
    %c0_i32_0 = arith.constant 0 : i32
    %c0_i32_1 = arith.constant 0 : i32
    return %c0_i32, %c0_i32_0 : i32, i32
  }
  func.func @transform_5(%arg0: i32) -> (i32, i32, i32) {
    %c0_i32 = arith.constant 0 : i32
    %c0_i32_0 = arith.constant 0 : i32
    %c0_i32_1 = arith.constant 0 : i32
    %c0_i32_2 = arith.constant 0 : i32
    return %c0_i32, %c0_i32_0, %c0_i32_1 : i32, i32, i32
  }
  func.func @transform_6(%arg0: i32) -> (i32, i32, i32) {
    %c0_i32 = arith.constant 0 : i32
    %c0_i32_0 = arith.constant 0 : i32
    %c0_i32_1 = arith.constant 0 : i32
    %c0_i32_2 = arith.constant 0 : i32
    return %c0_i32, %c0_i32_0, %c0_i32_1 : i32, i32, i32
  }
}

</mosaic_0001>

<bundles_post_ra>
// kernel: connect_model_decoder4.1
= control target key start
LH: loop header
LB: loop body
LE: loop exit
PB: predicated region body
PF: predicated region fallthrough
CT: control target
= control target key end

     0   :  { %vm104_vm0 = vcmask 1043456   ;;  %v1957_v3 = vmov 0   ;;  %vm91_vm1 = vcmask 293888   ;;  %s1960_s20 = smov 17   ;;  %s1961_s21 = smov 1   ;;  %vm581_vm6 = vcmask 261120   ;;  %s3315_s0 = inlined_call_operand.vmem [shape: f32[36,1024], index: 0, kind: input, shape index: {}]   ;;  %s3316_s1 = inlined_call_operand.vmem [shape: f32[32,36], index: 1, kind: input, shape index: {}]   ;;  %s3317_s2 = inlined_call_operand.vmem [shape: f32[32,1], index: 2, kind: input, shape index: {}]   ;;  %s3318_s5 = inlined_call_operand.vmem [shape: f32[9,1,512], index: 5, kind: input, shape index: {}]   ;;  %s3319_s3 = inlined_call_operand.vmem [shape: f32[9,4,32], index: 3, kind: input, shape index: {}]   ;;  %s3320_s4 = inlined_call_operand.vmem [shape: f32[4,1], index: 4, kind: input, shape index: {}]   ;;  %s3321_s6 = inlined_call_operand.vmem [shape: f32[2,4,256], index: 6, kind: output, shape index: {}]  }
   0x1   :  { %v59_v0 = vld [vmem:[%s3315_s0 + $0x100] sm:$0xf]  ;;  %v60_v1 = vld [vmem:[%s3315_s0 + $0x108] sm:$0xf]  ;;  %v61_v2 = vld [vmem:[%s3315_s0 + $0x110] sm:$0xf]  ;;  %1955 = vset.pattern.permute.xlu0 %v1957_v3  ;;  %1956 = vset.pattern.permute.xlu1 %v1957_v3 }
   0x2   :  { %1854 = vmatpush.msk.msra.mxu0 %vm104_vm0, %v59_v0  ;;  %1859 = vmatpush.msk.msra.mxu1 %vm104_vm0, %v60_v1  ;;  %v62_v4 = vld [vmem:[%s3315_s0 + $0x118] sm:$0xf]  ;;  %v51_v5 = vld [vmem:[%s3315_s0 + $0xc0] sm:$0xff]  ;;  %v52_v6 = vld [vmem:[%s3315_s0 + $0xc8] sm:$0xff]  ;;  %s1962_s22 = smov 127   ;;  %s1963_s23 = smov 113  }
   0x3   :  { %1864 = vmatpush.msk.msra.mxu2 %vm104_vm0, %v61_v2  ;;  %1869 = vmatpush.msk.msra.mxu3 %vm104_vm0, %v62_v4  ;;  %v53_v7 = vld [vmem:[%s3315_s0 + $0xd0] sm:$0xff]  ;;  %v54_v8 = vld [vmem:[%s3315_s0 + $0xd8] sm:$0xff]  ;;  %v43_v9 = vld [vmem:[%s3315_s0 + $0x80] sm:$0xff]  ;;  %s1964_s24 = smov 112   ;;  %s1965_s15 = smov 111  }
   0x4   :  { %141 = vmatpush.msra.mxu0 %v51_v5  ;;  %170 = vmatpush.msra.mxu1 %v52_v6  ;;  %v44_v10 = vld [vmem:[%s3315_s0 + $0x88] sm:$0xff]  ;;  %v45_v11 = vld [vmem:[%s3315_s0 + $0x90] sm:$0xff]  ;;  %v46_v12 = vld [vmem:[%s3315_s0 + $0x98] sm:$0xff] }
   0x5   :  { %199 = vmatpush.msra.mxu2 %v53_v7  ;;  %228 = vmatpush.msra.mxu3 %v54_v8  ;;  %v35_v13 = vld [vmem:[%s3315_s0 + $0x40] sm:$0xff]  ;;  %v36_v14 = vld [vmem:[%s3315_s0 + $0x48] sm:$0xff]  ;;  %v37_v15 = vld [vmem:[%s3315_s0 + $0x50] sm:$0xff] }
   0x6   :  { %142 = vmatpush.msra.mxu0 %v43_v9  ;;  %171 = vmatpush.msra.mxu1 %v44_v10  ;;  %v38_v16 = vld [vmem:[%s3315_s0 + $0x58] sm:$0xff]  ;;  %v27_v17 = vld [vmem:[%s3315_s0] sm:$0xff]  ;;  %v28_v18 = vld [vmem:[%s3315_s0 + $0x8] sm:$0xff] }
   0x7   :  { %200 = vmatpush.msra.mxu2 %v45_v11  ;;  %229 = vmatpush.msra.mxu3 %v46_v12  ;;  %v29_v19 = vld [vmem:[%s3315_s0 + $0x10] sm:$0xff]  ;;  %v30_v20 = vld [vmem:[%s3315_s0 + $0x18] sm:$0xff]  ;;  %v2068_v21 = vld [vmem:[%s3316_s1] sm:$0xff] }
   0x8   :  { %143 = vmatpush.msra.mxu0 %v35_v13  ;;  %172 = vmatpush.msra.mxu1 %v36_v14  ;;  %v64_v22 = vld [vmem:[%s3315_s0 + $0x128] sm:$0xf]  ;;  %v63_v23 = vld [vmem:[%s3315_s0 + $0x120] sm:$0xf]  ;;  %v65_v25 = vld [vmem:[%s3315_s0 + $0x130] sm:$0xf] }
   0x9   :  { %201 = vmatpush.msra.mxu2 %v37_v15  ;;  %230 = vmatpush.msra.mxu3 %v38_v16  ;;  %v67_v24 = vld [vmem:[%s3317_s2] sm:$0xff]  ;;  %v56_v26 = vld [vmem:[%s3315_s0 + $0xe8] sm:$0xff]  ;;  %v57_v28 = vld [vmem:[%s3315_s0 + $0xf0] sm:$0xff] }
   0xa   :  { %144 = vmatpush.msra.mxu0 %v27_v17  ;;  %173 = vmatpush.msra.mxu1 %v28_v18  ;;  %v55_v27 = vld [vmem:[%s3315_s0 + $0xe0] sm:$0xff]  ;;  %v66_v29 = vld [vmem:[%s3315_s0 + $0x138] sm:$0xf]  ;;  %v48_v30 = vld [vmem:[%s3315_s0 + $0xa8] sm:$0xff] }
   0xb   :  { %202 = vmatpush.msra.mxu2 %v29_v19  ;;  %231 = vmatpush.msra.mxu3 %v30_v20  ;;  %v47_v31 = vld [vmem:[%s3315_s0 + $0xa0] sm:$0xff]  ;;  %v49_v32 = vld [vmem:[%s3315_s0 + $0xb0] sm:$0xff]  ;;  %v58_v33 = vld [vmem:[%s3315_s0 + $0xf8] sm:$0xff] }
   0xc   :  { %1855 = vmatmul.msk.f32.vlgmr.msra.gmra.mxu0 %vm91_vm1, %v2068_v21  ;;  %1860 = vmatmul.msk.f32.vlgmr.msra.gmra.mxu1 %vm91_vm1, %v2068_v21  ;;  %v24_v34 = vld [vmem:[%s3316_s1 + $0x8] sm:$0xff]  ;;  %v69_v36 = vld [vmem:[%s3317_s2 + $0x10] sm:$0xff]  ;;  %v50_v38 = vld [vmem:[%s3315_s0 + $0xb8] sm:$0xff] }
   0xd   :  { %1865 = vmatmul.msk.f32.vlgmr.msra.gmra.mxu2 %vm91_vm1, %v2068_v21  ;;  %1870 = vmatmul.msk.f32.vlgmr.msra.gmra.mxu3 %vm91_vm1, %v2068_v21  ;;  %v40_v35 = vld [vmem:[%s3315_s0 + $0x68] sm:$0xff]  ;;  %v39_v40 = vld [vmem:[%s3315_s0 + $0x60] sm:$0xff]  ;;  %v41_v41 = vld [vmem:[%s3315_s0 + $0x70] sm:$0xff] }
   0xe   :  { %1879 = vmatpush.msk.msrb.mxu1 %vm104_vm0, %v64_v22  ;;  %1874 = vmatpush.msk.msrb.mxu0 %vm104_vm0, %v63_v23  ;;  %v68_v37 = vld [vmem:[%s3317_s2 + $0x8] sm:$0xff]  ;;  %v42_v42 = vld [vmem:[%s3315_s0 + $0x78] sm:$0xff]  ;;  %v31_v43 = vld [vmem:[%s3315_s0 + $0x20] sm:$0xff] }
   0xf   :  { %73 = vperm.xlu0 %1955, %v67_v24   ;;  %1884 = vmatpush.msk.msrb.mxu2 %vm104_vm0, %v65_v25  ;;  %v32_v39 = vld [vmem:[%s3315_s0 + $0x28] sm:$0xff]  ;;  %v33_v44 = vld [vmem:[%s3315_s0 + $0x30] sm:$0xff]  ;;  %v34_v45 = vld [vmem:[%s3315_s0 + $0x38] sm:$0xff] }
  0x10   :  { %286 = vmatpush.msrb.mxu1 %v56_v26  ;;  %257 = vmatpush.msrb.mxu0 %v55_v27  ;;  %v25_v46 = vld [vmem:[%s3316_s1 + $0x10] sm:$0xff]  ;;  %v70_v47 = vld [vmem:[%s3317_s2 + $0x18] sm:$0xff]  ;;  %s1959_s2 = smov 16  }
  0x11   :  { %315 = vmatpush.msrb.mxu2 %v57_v28  ;;  %1889 = vmatpush.msk.msrb.mxu3 %vm104_vm0, %v66_v29  ;;  %v26_v48 = vld [vmem:[%s3316_s1 + $0x18] sm:$0xff]  ;;  %s1958_s1 = smov 15  }
  0x12   :  { %287 = vmatpush.msrb.mxu1 %v48_v30  ;;  %258 = vmatpush.msrb.mxu0 %v47_v31 }
  0x13   :  { %316 = vmatpush.msrb.mxu2 %v49_v32  ;;  %344 = vmatpush.msrb.mxu3 %v58_v33 }
  0x14   :  { %1856 = vmatmul.msk.f32.gmra.mxu0 %vm91_vm1, %v24_v34  ;;  %1861 = vmatmul.msk.f32.gmra.mxu1 %vm91_vm1, %v24_v34 }
  0x15   :  { %1866 = vmatmul.msk.f32.gmra.mxu2 %vm91_vm1, %v24_v34  ;;  %1871 = vmatmul.msk.f32.gmra.mxu3 %vm91_vm1, %v24_v34 }
  0x16   :  { %288 = vmatpush.msrb.mxu1 %v40_v35  ;;  %83 = vperm.xlu1 %1956, %v69_v36  }
  0x17   :  { %78 = vperm.xlu0 %1955, %v68_v37   ;;  %345 = vmatpush.msrb.mxu3 %v50_v38 }
  0x18   :  { %289 = vmatpush.msrb.mxu1 %v32_v39  ;;  %259 = vmatpush.msrb.mxu0 %v39_v40 }
  0x19   :  { %317 = vmatpush.msrb.mxu2 %v41_v41  ;;  %346 = vmatpush.msrb.mxu3 %v42_v42 }
  0x1a   :  { %260 = vmatpush.msrb.mxu0 %v31_v43 }
  0x1b   :  { %318 = vmatpush.msrb.mxu2 %v33_v44  ;;  %347 = vmatpush.msrb.mxu3 %v34_v45 }
  0x1c   :  { %1857 = vmatmul.msk.f32.gmra.mxu0 %vm91_vm1, %v25_v46  ;;  %1862 = vmatmul.msk.f32.gmra.mxu1 %vm91_vm1, %v25_v46 }
  0x1d   :  { %1867 = vmatmul.msk.f32.gmra.mxu2 %vm91_vm1, %v25_v46  ;;  %1872 = vmatmul.msk.f32.gmra.mxu3 %vm91_vm1, %v25_v46 }
  0x1e   :  { %88 = vperm.xlu1 %1956, %v70_v47  }
  0x24   :  { %1858 = vmatmul.msk.f32.gmra.mxu0 %vm91_vm1, %v26_v48  ;;  %1863 = vmatmul.msk.f32.gmra.mxu1 %vm91_vm1, %v26_v48 }
  0x25   :  { %1868 = vmatmul.msk.f32.gmra.mxu2 %vm91_vm1, %v26_v48  ;;  %1873 = vmatmul.msk.f32.gmra.mxu3 %vm91_vm1, %v26_v48 }
  0x2c   :  { %1875 = vmatmul.msk.f32.vlgmr.msrb.gmra.mxu0 %vm91_vm1, %v2068_v21  ;;  %1880 = vmatmul.msk.f32.vlgmr.msrb.gmra.mxu1 %vm91_vm1, %v2068_v21 }
  0x2d   :  { %1885 = vmatmul.msk.f32.vlgmr.msrb.gmra.mxu2 %vm91_vm1, %v2068_v21  ;;  %1890 = vmatmul.msk.f32.vlgmr.msrb.gmra.mxu3 %vm91_vm1, %v2068_v21 }
  0x34   :  { %1876 = vmatmul.msk.f32.gmra.mxu0 %vm91_vm1, %v24_v34  ;;  %1881 = vmatmul.msk.f32.gmra.mxu1 %vm91_vm1, %v24_v34 }
  0x35   :  { %1886 = vmatmul.msk.f32.gmra.mxu2 %vm91_vm1, %v24_v34  ;;  %1891 = vmatmul.msk.f32.gmra.mxu3 %vm91_vm1, %v24_v34 }
  0x3c   :  { %1877 = vmatmul.msk.f32.gmra.mxu0 %vm91_vm1, %v25_v46  ;;  %1882 = vmatmul.msk.f32.gmra.mxu1 %vm91_vm1, %v25_v46 }
  0x3d   :  { %1887 = vmatmul.msk.f32.gmra.mxu2 %vm91_vm1, %v25_v46  ;;  %1892 = vmatmul.msk.f32.gmra.mxu3 %vm91_vm1, %v25_v46 }
  0x44   :  { %1878 = vmatmul.msk.f32.gmra.mxu0 %vm91_vm1, %v26_v48  ;;  %1883 = vmatmul.msk.f32.gmra.mxu1 %vm91_vm1, %v26_v48 }
  0x45   :  { %1888 = vmatmul.msk.f32.gmra.mxu2 %vm91_vm1, %v26_v48  ;;  %1893 = vmatmul.msk.f32.gmra.mxu3 %vm91_vm1, %v26_v48 }
  0x81   :  { %v74_v62 = vpop.permute.xlu0 %73 }
  0x89   :  { %v146_v49 = vpop.f32.mrf.mxu0  ;;  %v175_v50 = vpop.f32.mrf.mxu1 }
  0x8a   :  { %v147_v0 = vadd.f32 %v146_v49, %v74_v62  ;;  %v176_v1 = vadd.f32 %v175_v50, %v74_v62  ;;  %v79_v31 = vpop.permute.xlu0 %78 }
  0x8c   :  { %v361_v7 = vmax.f32 %v147_v0, 0.0  ;;  %v362_v8 = vmax.f32 %v176_v1, 0.0 }
  0x90   :  { %v204_v51 = vpop.f32.mrf.mxu2  ;;  %v233_v52 = vpop.f32.mrf.mxu3 }
  0x91   :  { %v2195_v53 = vpop.f32.mrf.mxu0  ;;  %v178_v54 = vpop.f32.mrf.mxu1  ;;  %v205_v18 = vadd.f32 %v204_v51, %v74_v62  ;;  %v234_v24 = vadd.f32 %v233_v52, %v74_v62 }
  0x92   :  { %v179_v33 = vadd.f32 %v178_v54, %v79_v31  ;;  %v150_v39 = vadd.f32 %v2195_v53, %v79_v31 }
  0x93   :  { %v363_v21 = vmax.f32 %v205_v18, 0.0  ;;  %v364_v27 = vmax.f32 %v234_v24, 0.0 }
  0x94   :  { %v370_v36 = vmax.f32 %v179_v33, 0.0  ;;  %v369_v42 = vmax.f32 %v150_v39, 0.0 }
  0x98   :  { %v2197_v55 = vpop.f32.mrf.mxu2  ;;  %v2203_v58 = vpop.f32.mrf.mxu3 }
  0x99   :  { %v2199_v56 = vpop.f32.mrf.mxu0  ;;  %v2201_v57 = vpop.f32.mrf.mxu1  ;;  %v237_v47 = vadd.f32 %v2203_v58, %v79_v31  ;;  %v208_v53 = vadd.f32 %v2197_v55, %v79_v31 }
  0x9a   :  { %v84_v55 = vpop.permute.xlu1 %83 }
  0x9b   :  { %v372_v50 = vmax.f32 %v237_v47, 0.0  ;;  %v371_v58 = vmax.f32 %v208_v53, 0.0 }
  0xa0   :  { %v2205_v59 = vpop.f32.mrf.mxu2  ;;  %v2211_v63 = vpop.f32.mrf.mxu3 }
  0xa1   :  { %v2207_v60 = vpop.f32.mrf.mxu0  ;;  %v2209_v61 = vpop.f32.mrf.mxu1 }
  0xa8   :  { %v2213_v2 = vpop.f32.mrf.mxu2  ;;  %v2215_v13 = vpop.f32.mrf.mxu3 }
  0xa9   :  { %v262_v3 = vpop.f32.mrf.mxu0  ;;  %v291_v4 = vpop.f32.mrf.mxu1 }
  0xaa   :  { %v263_v5 = vadd.f32 %v262_v3, %v74_v62  ;;  %v292_v6 = vadd.f32 %v291_v4, %v74_v62 }
  0xac   :  { %v365_v9 = vmax.f32 %v263_v5, 0.0  ;;  %v366_v10 = vmax.f32 %v292_v6, 0.0  ;;  %v153_v5 = vadd.f32 %v2199_v56, %v84_v55 }
  0xae   :  { %v393_v11 = vadd.f32 %v365_v9, %v361_v7  ;;  %v394_v12 = vadd.f32 %v366_v10, %v362_v8  ;;  %v377_v8 = vmax.f32 %v153_v5, 0.0 }
  0xb0   :  { %v2217_v14 = vmul.f32 0.5, %v393_v11  ;;  %v2219_v15 = vmul.f32 0.5, %v394_v12  ;;  %v320_v16 = vpop.f32.mrf.mxu2  ;;  %v349_v20 = vpop.f32.mrf.mxu3  ;;  %v182_v11 = vadd.f32 %v2201_v57, %v84_v55 }
  0xb1   :  { %v321_v17 = vadd.f32 %v320_v16, %v74_v62  ;;  %v350_v23 = vadd.f32 %v349_v20, %v74_v62  ;;  %v294_v30 = vpop.f32.mrf.mxu1  ;;  %v265_v35 = vpop.f32.mrf.mxu0 }
  0xb2   :  { %3336 = vst [vmem:[#allocation2_spill] sm:$0xff] %v2217_v14  ;;  %756 = vrot.lane.b32.xlu1 %v2219_v15, %s1958_s1  ;;  %511 = vrot.lane.b32.xlu0 %v2219_v15, %s1959_s2  ;;  %v295_v32 = vadd.f32 %v294_v30, %v79_v31  ;;  %v266_v37 = vadd.f32 %v265_v35, %v79_v31  ;;  %v378_v56 = vmax.f32 %v182_v11, 0.0 }
  0xb3   :  { %425 = vrot.lane.b32.xlu2 %v2217_v14, %s1960_s20  ;;  %v367_v19 = vmax.f32 %v321_v17, 0.0  ;;  %v368_v26 = vmax.f32 %v350_v23, 0.0  ;;  %v457_v17 = vlaneseq  ;;  %v240_v35 = vadd.f32 %v2211_v63, %v84_v55 }
  0xb4   :  { %v374_v34 = vmax.f32 %v295_v32, 0.0  ;;  %v373_v40 = vmax.f32 %v266_v37, 0.0 }
  0xb5   :  { %v395_v22 = vadd.f32 %v367_v19, %v363_v21  ;;  %v396_v28 = vadd.f32 %v368_v26, %v364_v27  ;;  %v2314_v20 = vand.u32 127, %v457_v17  ;;  %v211_v26 = vadd.f32 %v2205_v59, %v84_v55 }
  0xb6   :  { %v398_v38 = vadd.f32 %v374_v34, %v370_v36  ;;  %v397_v43 = vadd.f32 %v373_v40, %v369_v42  ;;  %v380_v37 = vmax.f32 %v240_v35, 0.0 }
  0xb7   :  { %v2233_v25 = vmul.f32 0.5, %v395_v22  ;;  %v2241_v29 = vmul.f32 0.5, %v396_v28  ;;  %vm459_vm2 = vcmp.lt.s32.totalorder %v2314_v20, 17  ;;  %v379_v30 = vmax.f32 %v211_v26, 0.0 }
  0xb8   :  { %v2256_v41 = vmul.f32 0.5, %v398_v38  ;;  %v2264_v44 = vmul.f32 0.5, %v397_v43  ;;  %v352_v45 = vpop.f32.mrf.mxu3  ;;  %v323_v49 = vpop.f32.mrf.mxu2  ;;  %vm535_vm3 = vcmp.lt.s32.totalorder %v2314_v20, 16  ;;  %vm945_vm4 = vcmp.lt.s32.totalorder %v2314_v20, 1 }
  0xb9   :  { %v353_v46 = vadd.f32 %v352_v45, %v79_v31  ;;  %v324_v51 = vadd.f32 %v323_v49, %v79_v31  ;;  %v268_v3 = vpop.f32.mrf.mxu0  ;;  %v297_v7 = vpop.f32.mrf.mxu1  ;;  %vm780_vm5 = vcmp.lt.s32.totalorder %v2314_v20, 15  ;;  %vm1199_vm7 = vcmp.lt.s32.totalorder %v2314_v20, 127 }
  0xba   :  { %913 = vrot.lane.b32.xlu1 %v2217_v14, %s1961_s21  ;;  %748 = vrot.lane.b32.xlu0 %v2217_v14, %s1958_s1  ;;  %3337 = vst [vmem:[#allocation3_spill] sm:$0xff] %v2264_v44  ;;  %v269_v4 = vadd.f32 %v268_v3, %v84_v55  ;;  %v298_v10 = vadd.f32 %v297_v7, %v84_v55  ;;  %v2337_v31 = vpop.permute.xlu1 %88  ;;  %vm1364_vm8 = vcmp.lt.s32.totalorder %v2314_v20, 113  ;;  %vm1529_vm9 = vcmp.lt.s32.totalorder %v2314_v20, 112 }
  0xbb   :  { %433 = vrot.lane.b32.xlu2 %v2219_v15, %s1960_s20  ;;  %v376_v48 = vmax.f32 %v353_v46, 0.0  ;;  %v375_v54 = vmax.f32 %v324_v51, 0.0  ;;  %v185_v5 = vadd.f32 %v2209_v61, %v2337_v31  ;;  %vm1694_vm10 = vcmp.lt.s32.totalorder %v2314_v20, 111 }
  0xbc   :  { %v381_v6 = vmax.f32 %v269_v4, 0.0  ;;  %v382_v16 = vmax.f32 %v298_v10, 0.0  ;;  %v156_v4 = vadd.f32 %v2207_v60, %v2337_v31 }
  0xbd   :  { %v400_v52 = vadd.f32 %v376_v48, %v372_v50  ;;  %v399_v0 = vadd.f32 %v375_v54, %v371_v58  ;;  %v386_v10 = vmax.f32 %v185_v5, 0.0 }
  0xbe   :  { %v401_v9 = vadd.f32 %v381_v6, %v377_v8  ;;  %v402_v18 = vadd.f32 %v382_v16, %v378_v56 }
  0xbf   :  { %v2280_v62 = vmul.f32 0.5, %v400_v52  ;;  %v2288_v1 = vmul.f32 0.5, %v399_v0 }
  0xc0   :  { %v2304_v12 = vmul.f32 0.5, %v401_v9  ;;  %v2316_v57 = vmul.f32 0.5, %v402_v18  ;;  %v326_v21 = vpop.f32.mrf.mxu2  ;;  %v355_v28 = vpop.f32.mrf.mxu3  ;;  %v385_v9 = vmax.f32 %v156_v4, 0.0 }
  0xc1   :  { %v327_v22 = vadd.f32 %v326_v21, %v84_v55  ;;  %v356_v32 = vadd.f32 %v355_v28, %v84_v55  ;;  %v271_v51 = vpop.f32.mrf.mxu0  ;;  %v300_v52 = vpop.f32.mrf.mxu1 }
  0xc2   :  { %1167 = vrot.lane.b32.xlu1 %v2217_v14, %s1962_s22  ;;  %441 = vrot.lane.b32.xlu0 %v2233_v25, %s1960_s20  ;;  %v272_v53 = vadd.f32 %v271_v51, %v2337_v31  ;;  %v301_v54 = vadd.f32 %v300_v52, %v2337_v31  ;;  %v214_v51 = vadd.f32 %v2213_v2, %v2337_v31 }
  0xc3   :  { %503 = vrot.lane.b32.xlu2 %v2217_v14, %s1959_s2  ;;  %v383_v27 = vmax.f32 %v327_v22, 0.0  ;;  %v384_v59 = vmax.f32 %v356_v32, 0.0  ;;  %v243_v52 = vadd.f32 %v2215_v13, %v2337_v31 }
  0xc4   :  { %v389_v7 = vmax.f32 %v272_v53, 0.0  ;;  %v390_v8 = vmax.f32 %v301_v54, 0.0 }
  0xc5   :  { %v403_v33 = vadd.f32 %v383_v27, %v379_v30  ;;  %v404_v38 = vadd.f32 %v384_v59, %v380_v37 }
  0xc6   :  { %v405_v60 = vadd.f32 %v389_v7, %v385_v9  ;;  %v406_v11 = vadd.f32 %v390_v8, %v386_v10 }
  0xc7   :  { %v2340_v36 = vmul.f32 0.5, %v403_v33  ;;  %v2353_v43 = vmul.f32 0.5, %v404_v38 }
  0xc8   :  { %v2422_v26 = vmul.f32 0.5, %v406_v11  ;;  %v358_v35 = vpop.f32.mrf.mxu3 }
  0xc9   :  { %3338 = vst [vmem:[#allocation4_spill] sm:$0xff] %v2340_v36  ;;  %v359_v37 = vadd.f32 %v358_v35, %v2337_v31 }
  0xca   :  { %449 = vrot.lane.b32.xlu1 %v2241_v29, %s1960_s20  ;;  %772 = vrot.lane.b32.xlu0 %v2241_v29, %s1958_s1  ;;  %3339 = vst [vmem:[#allocation5_spill] sm:$0xff] %v2353_v43 }
  0xcb   :  { %921 = vrot.lane.b32.xlu2 %v2219_v15, %s1961_s21  ;;  %v392_v54 = vmax.f32 %v359_v37, 0.0 }
  0xd2   :  { %519 = vrot.lane.b32.xlu1 %v2233_v25, %s1959_s2  ;;  %929 = vrot.lane.b32.xlu0 %v2233_v25, %s1961_s21 }
  0xd3   :  { %527 = vrot.lane.b32.xlu2 %v2241_v29, %s1959_s2 }
  0xda   :  { %937 = vrot.lane.b32.xlu1 %v2241_v29, %s1961_s21  ;;  %435 = vrot.lane.b32.xlu0 %v2256_v41, %s1960_s20 }
  0xdb   :  { %764 = vrot.lane.b32.xlu2 %v2233_v25, %s1958_s1 }
  0xe2   :  { %513 = vrot.lane.b32.xlu1 %v2256_v41, %s1959_s2  ;;  %505 = vrot.lane.b32.xlu0 %v2264_v44, %s1959_s2 }
  0xe3   :  { %427 = vrot.lane.b32.xlu2 %v2264_v44, %s1960_s20 }
  0xea   :  { %750 = vrot.lane.b32.xlu1 %v2264_v44, %s1958_s1  ;;  %923 = vrot.lane.b32.xlu0 %v2256_v41, %s1961_s21 }
  0xeb   :  { %758 = vrot.lane.b32.xlu2 %v2256_v41, %s1958_s1 }
  0xf2   :  { %1169 = vrot.lane.b32.xlu1 %v2264_v44, %s1962_s22  ;;  %529 = vrot.lane.b32.xlu0 %v2280_v62, %s1959_s2 }
  0xf3   :  { %915 = vrot.lane.b32.xlu2 %v2264_v44, %s1961_s21 }
  0xfa   :  { %443 = vrot.lane.b32.xlu1 %v2288_v1, %s1960_s20  ;;  %766 = vrot.lane.b32.xlu0 %v2288_v1, %s1958_s1 }
  0xfb   :  { %451 = vrot.lane.b32.xlu2 %v2280_v62, %s1960_s20 }
 0x102   :  { %774 = vrot.lane.b32.xlu1 %v2280_v62, %s1958_s1  ;;  %1193 = vrot.lane.b32.xlu0 %v2280_v62, %s1962_s22 }
 0x103   :  { %521 = vrot.lane.b32.xlu2 %v2288_v1, %s1959_s2 }
 0x10a   :  { %931 = vrot.lane.b32.xlu1 %v2288_v1, %s1961_s21  ;;  %429 = vrot.lane.b32.xlu0 %v2304_v12, %s1960_s20 }
 0x10b   :  { %939 = vrot.lane.b32.xlu2 %v2280_v62, %s1961_s21 }
 0x10d   :  { %v2312_v19 = vpop.permute.xlu2 %425 }
 0x112   :  { %437 = vrot.lane.b32.xlu1 %v2316_v57, %s1960_s20  ;;  %760 = vrot.lane.b32.xlu0 %v2316_v57, %s1958_s1 }
 0x113   :  { %515 = vrot.lane.b32.xlu2 %v2316_v57, %s1959_s2 }
 0x115   :  { %v434_v23 = vpop.permute.xlu2 %433 }
 0x116   :  { %v2328_v24 = vsel %vm459_vm2, %v2312_v19, %v434_v23 }
 0x11a   :  { %507 = vrot.lane.b32.xlu1 %v2304_v12, %s1959_s2  ;;  %917 = vrot.lane.b32.xlu0 %v2304_v12, %s1961_s21 }
 0x11b   :  { %752 = vrot.lane.b32.xlu2 %v2304_v12, %s1958_s1 }
 0x11d   :  { %v504_v34 = vpop.permute.xlu2 %503 }
 0x122   :  { %1171 = vrot.lane.b32.xlu1 %v2304_v12, %s1962_s22  ;;  %925 = vrot.lane.b32.xlu0 %v2316_v57, %s1961_s21 }
 0x123   :  { %445 = vrot.lane.b32.xlu2 %v2340_v36, %s1960_s20 }
 0x124   :  { %v757_v39 = vpop.permute.xlu1 %756  ;;  %v512_v40 = vpop.permute.xlu0 %511 }
 0x125   :  { %v2351_v63 = vsel %vm535_vm3, %v504_v34, %v512_v40  ;;  %v922_v42 = vpop.permute.xlu2 %921 }
 0x12a   :  { %531 = vrot.lane.b32.xlu1 %v2353_v43, %s1959_s2  ;;  %453 = vrot.lane.b32.xlu0 %v2353_v43, %s1960_s20 }
 0x12b   :  { %776 = vrot.lane.b32.xlu2 %v2353_v43, %s1958_s1 }
 0x12c   :  { %v914_v45 = vpop.permute.xlu1 %913  ;;  %v749_v46 = vpop.permute.xlu0 %748 }
 0x12d   :  { %v2365_v47 = vsel %vm945_vm4, %v914_v45, %v922_v42  ;;  %v2369_v48 = vsel %vm780_vm5, %v749_v46, %v757_v39  ;;  %v528_v49 = vpop.permute.xlu2 %527 }
 0x12e   :  { %v2373_v50 = vsel %vm535_vm3, %v528_v49, %v504_v34  ;;  %v329_v34 = vpop.f32.mrf.mxu2 }
 0x12f   :  { %v330_v59 = vadd.f32 %v329_v34, %v2337_v31 }
 0x131   :  { %v391_v53 = vmax.f32 %v330_v59, 0.0 }
 0x132   :  { %768 = vrot.lane.b32.xlu1 %v2340_v36, %s1958_s1  ;;  %523 = vrot.lane.b32.xlu0 %v2340_v36, %s1959_s2 }
 0x133   :  { %941 = vrot.lane.b32.xlu2 %v2353_v43, %s1961_s21 }
 0x134   :  { %v2383_v58 = vpop.permute.xlu1 %1167  ;;  %v442_v0 = vpop.permute.xlu0 %441 }
 0x135   :  { %3340 = vst [vmem:[#allocation6_spill] sm:$0xff] %v2383_v58  ;;  %v2387_v3 = vsel %vm459_vm2, %v434_v23, %v442_v0  ;;  %v765_v55 = vpop.permute.xlu2 %764  ;;  %v2420_v23 = vmul.f32 0.5, %v405_v60 }
 0x136   :  { %3341 = vst [vmem:[#allocation7_spill] sm:$0xff] %v2387_v3  ;;  %v2395_v6 = vsel %vm780_vm5, %v757_v39, %v765_v55 }
 0x137   :  { %3342 = vst [vmem:[#allocation8_spill] sm:$0xff] %v2395_v6 }
 0x13a   :  { %933 = vrot.lane.b32.xlu1 %v2340_v36, %s1961_s21  ;;  %1195 = vrot.lane.b32.xlu0 %v2353_v43, %s1962_s22 }
 0x13b   :  { %1187 = vrot.lane.b32.xlu2 %v2340_v36, %s1962_s22 }
 0x13c   :  { %v450_v61 = vpop.permute.xlu1 %449  ;;  %v773_v16 = vpop.permute.xlu0 %772 }
 0x13d   :  { %v2405_v56 = vsel %vm459_vm2, %v442_v0, %v450_v61  ;;  %v2410_v17 = vsel %vm459_vm2, %v450_v61, %v2312_v19  ;;  %v2414_v18 = vsel %vm780_vm5, %v765_v55, %v773_v16  ;;  %v2418_v21 = vsel %vm780_vm5, %v773_v16, %v749_v46  ;;  %v428_v22 = vpop.permute.xlu2 %427 }
 0x13e   :  { %3343 = vst [vmem:[#allocation9_spill] sm:$0xff] %v2405_v56  ;;  %v387_v0 = vmax.f32 %v214_v51, 0.0  ;;  %v388_v55 = vmax.f32 %v243_v52, 0.0 }
 0x13f   :  { %3344 = vst [vmem:[#allocation10_spill] sm:$0xff] %v2414_v18 }
 0x140   :  { %v408_v4 = vadd.f32 %v392_v54, %v388_v55 }
 0x142   :  { %431 = vrot.lane.b32.xlu1 %v2420_v23, %s1960_s20  ;;  %517 = vrot.lane.b32.xlu0 %v2422_v26, %s1959_s2  ;;  %v2482_v9 = vmul.f32 0.5, %v408_v4 }
 0x143   :  { %439 = vrot.lane.b32.xlu2 %v2422_v26, %s1960_s20 }
 0x144   :  { %v520_v19 = vpop.permute.xlu1 %519  ;;  %v930_v27 = vpop.permute.xlu0 %929 }
 0x145   :  { %v2432_v28 = vsel %vm535_vm3, %v520_v19, %v528_v49  ;;  %v2436_v30 = vsel %vm535_vm3, %v512_v40, %v520_v19  ;;  %v2440_v32 = vsel %vm945_vm4, %v922_v42, %v930_v27  ;;  %v759_v33 = vpop.permute.xlu2 %758 }
 0x146   :  { %3345 = vst [vmem:[#allocation11_spill] sm:$0xff] %v2440_v32 }
 0x14a   :  { %762 = vrot.lane.b32.xlu1 %v2422_v26, %s1958_s1  ;;  %754 = vrot.lane.b32.xlu0 %v2420_v23, %s1958_s1 }
 0x14b   :  { %509 = vrot.lane.b32.xlu2 %v2420_v23, %s1959_s2 }
 0x14c   :  { %v938_v38 = vpop.permute.xlu1 %937  ;;  %v436_v39 = vpop.permute.xlu0 %435 }
 0x14d   :  { %v2452_v40 = vsel %vm945_vm4, %v930_v27, %v938_v38  ;;  %v2456_v42 = vsel %vm945_vm4, %v938_v38, %v914_v45  ;;  %v2460_v46 = vsel %vm459_vm2, %v428_v22, %v436_v39  ;;  %v916_v49 = vpop.permute.xlu2 %915  ;;  %v407_v45 = vadd.f32 %v391_v53, %v387_v0 }
 0x14e   :  { %3346 = vst [vmem:[#allocation12_spill] sm:$0xff] %v2452_v40 }
 0x14f   :  { %3347 = vst [vmem:[#allocation13_spill] sm:$0xff] %v2456_v42  ;;  %v2480_v8 = vmul.f32 0.5, %v407_v45 }
 0x152   :  { %919 = vrot.lane.b32.xlu1 %v2420_v23, %s1961_s21  ;;  %927 = vrot.lane.b32.xlu0 %v2422_v26, %s1961_s21 }
 0x153   :  { %1173 = vrot.lane.b32.xlu2 %v2420_v23, %s1962_s22 }
 0x154   :  { %v514_v5 = vpop.permute.xlu1 %513  ;;  %v506_v2 = vpop.permute.xlu0 %505 }
 0x155   :  { %v2474_v13 = vsel %vm535_vm3, %v506_v2, %v514_v5  ;;  %v452_v31 = vpop.permute.xlu2 %451 }
 0x156   :  { %v2478_v7 = vsel %vm459_vm2, %v452_v31, %v428_v22 }
 0x15a   :  { %455 = vrot.lane.b32.xlu1 %v2482_v9, %s1960_s20  ;;  %447 = vrot.lane.b32.xlu0 %v2480_v8, %s1960_s20 }
 0x15b   :  { %1181 = vrot.lane.b32.xlu2 %v2422_v26, %s1962_s22 }
 0x15c   :  { %v751_v10 = vpop.permute.xlu1 %750  ;;  %v924_v60 = vpop.permute.xlu0 %923 }
 0x15d   :  { %v2492_v11 = vsel %vm780_vm5, %v751_v10, %v759_v33  ;;  %v2496_v61 = vsel %vm945_vm4, %v916_v49, %v924_v60  ;;  %v522_v16 = vpop.permute.xlu2 %521 }
 0x15e   :  { %v2500_v22 = vsel %vm535_vm3, %v514_v5, %v522_v16 }
 0x162   :  { %525 = vrot.lane.b32.xlu1 %v2480_v8, %s1959_s2  ;;  %778 = vrot.lane.b32.xlu0 %v2482_v9, %s1958_s1 }
 0x163   :  { %533 = vrot.lane.b32.xlu2 %v2482_v9, %s1959_s2 }
 0x164   :  { %v2508_v19 = vpop.permute.xlu1 %1169  ;;  %v530_v27 = vpop.permute.xlu0 %529 }
 0x165   :  { %3348 = vst [vmem:[#allocation14_spill] sm:$0xff] %v2508_v19  ;;  %v2512_v34 = vsel %vm535_vm3, %v522_v16, %v530_v27  ;;  %v2516_v35 = vsel %vm535_vm3, %v530_v27, %v506_v2  ;;  %v940_v59 = vpop.permute.xlu2 %939 }
 0x166   :  { %v2520_v37 = vsel %vm945_vm4, %v940_v59, %v916_v49 }
 0x167   :  { %3349 = vst [vmem:[#allocation15_spill] sm:$0xff] %v2520_v37 }
 0x16a   :  { %935 = vrot.lane.b32.xlu1 %v2480_v8, %s1961_s21  ;;  %1197 = vrot.lane.b32.xlu0 %v2482_v9, %s1962_s22 }
 0x16b   :  { %770 = vrot.lane.b32.xlu2 %v2480_v8, %s1958_s1 }
 0x16c   :  { %v444_v38 = vpop.permute.xlu1 %443  ;;  %v767_v51 = vpop.permute.xlu0 %766 }
 0x16d   :  { %v2530_v52 = vsel %vm459_vm2, %v444_v38, %v452_v31  ;;  %v2534_v53 = vsel %vm459_vm2, %v436_v39, %v444_v38  ;;  %v2538_v49 = vsel %vm780_vm5, %v759_v33, %v767_v51  ;;  %v2540_v54 = vpop.permute.xlu2 %515 }
 0x16e   :  { %3350 = vst [vmem:[#allocation16_spill] sm:$0xff] %v2530_v52 }
 0x16f   :  { %3351 = vst [vmem:[#allocation17_spill] sm:$0xff] %v2534_v53 }
 0x170   :  { %3352 = vst [vmem:[#allocation18_spill] sm:$0xff] %v2538_v49 }
 0x172   :  { %1191 = vrot.lane.b32.xlu1 %v2241_v29, %s1962_s22  ;;  %1185 = vrot.lane.b32.xlu0 %v2288_v1, %s1962_s22 }
 0x173   :  { %943 = vrot.lane.b32.xlu2 %v2482_v9, %s1961_s21 }
 0x174   :  { %v775_v0 = vpop.permute.xlu1 %774  ;;  %v2548_v55 = vpop.permute.xlu0 %1193 }
 0x175   :  { %3353 = vst [vmem:[#allocation19_spill] sm:$0xff] %v2548_v55  ;;  %v2552_v39 = vsel %vm780_vm5, %v767_v51, %v775_v0  ;;  %v2556_v33 = vsel %vm780_vm5, %v775_v0, %v751_v10  ;;  %v753_v45 = vpop.permute.xlu2 %752 }
 0x176   :  { %3354 = vst [vmem:[#allocation20_spill] sm:$0xff] %v2552_v39 }
 0x17a   :  { %1338 = vrot.lane.b32.xlu1 %v2420_v23, %s1963_s23  ;;  %1183 = vrot.lane.b32.xlu0 %v2233_v25, %s1962_s22 }
 0x17b   :  { %1189 = vrot.lane.b32.xlu2 %v2480_v8, %s1962_s22 }
 0x17c   :  { %v932_v4 = vpop.permute.xlu1 %931  ;;  %v2564_v5 = vpop.permute.xlu0 %429 }
 0x17d   :  { %v2568_v2 = vsel %vm945_vm4, %v932_v4, %v940_v59  ;;  %v2572_v31 = vsel %vm945_vm4, %v924_v60, %v932_v4  ;;  %v446_v10 = vpop.permute.xlu2 %445 }
 0x17e   :  { %3355 = vst [vmem:[#allocation21_spill] sm:$0xff] %v2568_v2 }
 0x17f   :  { %3356 = vst [vmem:[#allocation22_spill] sm:$0xff] %v2572_v31 }
 0x182   :  { %1336 = vrot.lane.b32.xlu1 %v2304_v12, %s1963_s23  ;;  %1177 = vrot.lane.b32.xlu0 %v2256_v41, %s1962_s22 }
 0x183   :  { %1179 = vrot.lane.b32.xlu2 %v2316_v57, %s1962_s22 }
 0x184   :  { %v2580_v16 = vpop.permute.xlu1 %437  ;;  %v761_v27 = vpop.permute.xlu0 %760 }
 0x185   :  { %v2585_v59 = vsel %vm459_vm2, %v2580_v16, %v446_v10  ;;  %v2589_v60 = vsel %vm780_vm5, %v753_v45, %v761_v27  ;;  %v777_v38 = vpop.permute.xlu2 %776 }
 0x186   :  { %v2593_v51 = vsel %vm780_vm5, %v777_v38, %v753_v45 }
 0x18a   :  { %1175 = vrot.lane.b32.xlu1 %v2219_v15, %s1962_s22  ;;  %1360 = vrot.lane.b32.xlu0 %v2353_v43, %s1963_s23 }
 0x18b   :  { %1362 = vrot.lane.b32.xlu2 %v2482_v9, %s1963_s23 }
 0x18c   :  { %v2601_v0 = vpop.permute.xlu1 %507  ;;  %v2603_v4 = vpop.permute.xlu0 %917 }
 0x18d   :  { %v942_v55 = vpop.permute.xlu2 %941 }
 0x18e   :  { %v2608_v58 = vsel %vm945_vm4, %v942_v55, %v2603_v4 }
 0x18f   :  { %3357 = vst [vmem:[#allocation23_spill] sm:$0xff] %v2608_v58  ;;  %v2734_v58 = vld [vmem:[%s3319_s3 + $0x4] sm:$0xf] }
 0x192   :  { %1358 = vrot.lane.b32.xlu1 %v2280_v62, %s1963_s23  ;;  %1352 = vrot.lane.b32.xlu0 %v2340_v36, %s1963_s23 }
 0x193   :  { %1354 = vrot.lane.b32.xlu2 %v2480_v8, %s1963_s23 }
 0x194   :  { %v2616_v45 = vpop.permute.xlu1 %1171  ;;  %v2618_v40 = vpop.permute.xlu0 %925 }
 0x195   :  { %3358 = vst [vmem:[#allocation24_spill] sm:$0xff] %v2616_v45  ;;  %v2620_v32 = vpop.permute.xlu2 %1187 }
 0x19a   :  { %1350 = vrot.lane.b32.xlu1 %v2288_v1, %s1963_s23  ;;  %1346 = vrot.lane.b32.xlu0 %v2422_v26, %s1963_s23 }
 0x19b   :  { %1334 = vrot.lane.b32.xlu2 %v2264_v44, %s1963_s23 }
 0x19c   :  { %v2628_v2 = vpop.permute.xlu1 %531  ;;  %v2630_v19 = vpop.permute.xlu0 %453 }
 0x19d   :  { %v2635_v31 = vsel %vm459_vm2, %v446_v10, %v2630_v19  ;;  %v2637_v45 = vpop.permute.xlu2 %439 }
 0x19e   :  { %3359 = vst [vmem:[#allocation25_spill] sm:$0xff] %v2635_v31 }
 0x1a2   :  { %1348 = vrot.lane.b32.xlu1 %v2233_v25, %s1963_s23  ;;  %1344 = vrot.lane.b32.xlu0 %v2316_v57, %s1963_s23 }
 0x1a3   :  { %1332 = vrot.lane.b32.xlu2 %v2217_v14, %s1963_s23 }
 0x1a4   :  { %v769_v18 = vpop.permute.xlu1 %768  ;;  %v2645_v6 = vpop.permute.xlu0 %523 }
 0x1a5   :  { %v2649_v39 = vsel %vm780_vm5, %v769_v18, %v777_v38  ;;  %v2653_v10 = vsel %vm780_vm5, %v761_v27, %v769_v18  ;;  %v510_v49 = vpop.permute.xlu2 %509 }
 0x1a6   :  { %3360 = vst [vmem:[#allocation26_spill] sm:$0xff] %v2649_v39  ;;  %v2677_v39 = vld [vmem:[%s3318_s5 + $0x4] sm:$0xf] }
 0x1a7   :  { %3361 = vst [vmem:[#allocation27_spill] sm:$0xff] %v2653_v10  ;;  %v2702_v10 = vld [vmem:[%s3318_s5] sm:$0xf] }
 0x1aa   :  { %1342 = vrot.lane.b32.xlu1 %v2256_v41, %s1963_s23  ;;  %1527 = vrot.lane.b32.xlu0 %v2482_v9, %s1964_s24 }
 0x1ab   :  { %1356 = vrot.lane.b32.xlu2 %v2241_v29, %s1963_s23 }
 0x1ac   :  { %v934_v42 = vpop.permute.xlu1 %933  ;;  %v2661_v56 = vpop.permute.xlu0 %1195 }
 0x1ad   :  { %3362 = vst [vmem:[#allocation28_spill] sm:$0xff] %v2661_v56  ;;  %v2665_v38 = vsel %vm945_vm4, %v934_v42, %v942_v55  ;;  %v2670_v18 = vsel %vm945_vm4, %v2618_v40, %v934_v42  ;;  %v2672_v27 = vpop.permute.xlu2 %1173  ;;  %v556_v55 = vperm.slane %v2677_v39, 1 }
 0x1ae   :  { %3363 = vst [vmem:[#allocation29_spill] sm:$0xff] %v2665_v38 }
 0x1af   :  { %3364 = vst [vmem:[#allocation30_spill] sm:$0xff] %v2670_v18  ;;  %v568_v52 = vmul.f32 %v556_v55, %v2474_v13  ;;  %v470_v13 = vsel %vm459_vm2, %v2564_v5, %v2580_v16 }
 0x1b0   :  { %3365 = vst [vmem:[#allocation31_spill] sm:$0xff] %v2672_v27  ;;  %v546_v27 = vsel %vm535_vm3, %v2601_v0, %v2540_v54 }
 0x1b1   :  { %v572_v3 = vmul.f32 %v556_v55, %v546_v27 }
 0x1b2   :  { %1525 = vrot.lane.b32.xlu1 %v2353_v43, %s1964_s24  ;;  %1519 = vrot.lane.b32.xlu0 %v2480_v8, %s1964_s24 }
 0x1b3   :  { %1503 = vrot.lane.b32.xlu2 %v2420_v23, %s1964_s24 }
 0x1b4   :  { %v2686_v42 = vpop.permute.xlu1 %431  ;;  %v2688_v56 = vpop.permute.xlu0 %517 }
 0x1b5   :  { %v547_v38 = vsel %vm535_vm3, %v510_v49, %v2688_v56  ;;  %v2693_v18 = vpop.permute.xlu2 %1181 }
 0x1b6   :  { %v576_v43 = vmul.f32 %v556_v55, %v547_v38  ;;  %v471_v38 = vsel %vm459_vm2, %v2686_v42, %v2637_v45 }
 0x1b8   :  { %617 = vmatpush.msra.mxu1 %v576_v43  ;;  %v479_v43 = vperm.slane %v2702_v10, 1 }
 0x1ba   :  { %1517 = vrot.lane.b32.xlu1 %v2340_v36, %s1964_s24  ;;  %1499 = vrot.lane.b32.xlu0 %v2264_v44, %s1964_s24  ;;  %v564_v36 = vmul.f32 %v556_v55, %v2351_v63  ;;  %v555_v44 = vperm.slane %v2677_v39, 0  ;;  %v499_v31 = vmul.f32 %v479_v43, %v471_v38  ;;  %v550_v63 = vsel %vm535_vm3, %v2628_v2, %v2601_v0 }
 0x1bb   :  { %1501 = vrot.lane.b32.xlu2 %v2304_v12, %s1964_s24  ;;  %618 = vmatpush.msra.mxu1 %v572_v3  ;;  %v495_v55 = vmul.f32 %v479_v43, %v470_v13 }
 0x1bc   :  { %v2716_v27 = vpop.permute.xlu1 %762  ;;  %v2718_v53 = vpop.permute.xlu0 %754  ;;  %v571_v38 = vmul.f32 %v555_v44, %v550_v63 }
 0x1bd   :  { %619 = vmatpush.msra.mxu1 %v568_v52  ;;  %v2726_v37 = vpop.permute.xlu2 %533  ;;  %v2743_v52 = vld [vmem:[%s3318_s5 + $0x8] sm:$0xf]  ;;  %v792_v0 = vsel %vm780_vm5, %v2718_v53, %v2716_v27 }
 0x1be   :  { %v551_v3 = vsel %vm535_vm3, %v2726_v37, %v510_v49  ;;  %v491_v49 = vmul.f32 %v479_v43, %v2460_v46  ;;  %v487_v46 = vmul.f32 %v479_v43, %v2328_v24  ;;  %v2772_v24 = vld [vmem:[%s3319_s3] sm:$0xf]  ;;  %v956_v43 = vsel %vm945_vm4, %v2603_v4, %v2618_v40 }
 0x1bf   :  { %v575_v16 = vmul.f32 %v555_v44, %v551_v3  ;;  %620 = vmatpush.msra.mxu1 %v564_v36  ;;  %v801_v36 = vperm.slane %v2743_v52, 1 }
 0x1c0   :  { %1897 = vmatmul.msk.f32.vlgmr.msra.gmra.mxu1 %vm581_vm6, %v2734_v58 }
 0x1c1   :  { %700 = vmatpush.msrb.mxu1 %v499_v31  ;;  %597 = vmatpush.msra.mxu0 %v575_v16  ;;  %v567_v31 = vmul.f32 %v555_v44, %v2516_v35  ;;  %v821_v63 = vmul.f32 %v801_v36, %v792_v0  ;;  %v2777_v35 = vld [vmem:[%s3318_s5 + $0xc] sm:$0xf]  ;;  %v474_v0 = vsel %vm459_vm2, %v2630_v19, %v2564_v5  ;;  %v2819_v19 = vld [vmem:[%s3319_s3 + $0x8] sm:$0xf] }
 0x1c2   :  { %1511 = vrot.lane.b32.xlu1 %v2422_v26, %s1964_s24  ;;  %1497 = vrot.lane.b32.xlu0 %v2217_v14, %s1964_s24  ;;  %v817_v14 = vmul.f32 %v801_v36, %v2589_v60  ;;  %v966_v60 = vperm.slane %v2777_v35, 1 }
 0x1c3   :  { %701 = vmatpush.msrb.mxu1 %v495_v55  ;;  %1340 = vrot.lane.b32.xlu2 %v2219_v15, %s1963_s23  ;;  %v563_v55 = vmul.f32 %v555_v44, %v2373_v50  ;;  %v813_v44 = vmul.f32 %v801_v36, %v2492_v11  ;;  %v478_v11 = vperm.slane %v2702_v10, 0 }
 0x1c4   :  { %598 = vmatpush.msra.mxu0 %v571_v38  ;;  %v2761_v13 = vpop.permute.xlu1 %919  ;;  %v2763_v3 = vpop.permute.xlu0 %927  ;;  %v982_v40 = vmul.f32 %v966_v60, %v956_v43  ;;  %v974_v5 = vmul.f32 %v966_v60, %v2365_v47 }
 0x1c5   :  { %702 = vmatpush.msrb.mxu1 %v491_v49  ;;  %v2765_v16 = vpop.permute.xlu2 %770  ;;  %v957_v50 = vsel %vm945_vm4, %v2761_v13, %v2763_v3  ;;  %v494_v4 = vmul.f32 %v478_v11, %v474_v0  ;;  %v486_v43 = vmul.f32 %v478_v11, %v2410_v17  ;;  %v2861_v17 = vld [vmem:[%s3318_s5 + $0x14] sm:$0xf] }
 0x1c6   :  { %599 = vmatpush.msra.mxu0 %v567_v31 }
 0x1c7   :  { %703 = vmatpush.msrb.mxu1 %v487_v46  ;;  %v986_v46 = vmul.f32 %v966_v60, %v957_v50 }
 0x1c8   :  { %600 = vmatpush.msra.mxu0 %v563_v55  ;;  %1901 = vmatmul.msk.f32.vlgmr.msrb.gmra.mxu1 %vm581_vm6, %v2772_v24  ;;  %v558_v55 = vperm.slane %v2677_v39, 3 }
 0x1c9   :  { %861 = vmatpush.msra.mxu1 %v821_v63  ;;  %1896 = vmatmul.msk.f32.vlgmr.msra.gmra.mxu0 %vm581_vm6, %v2734_v58  ;;  %v978_v63 = vmul.f32 %v966_v60, %v2496_v61  ;;  %v557_v61 = vperm.slane %v2677_v39, 2 }
 0x1ca   :  { %1509 = vrot.lane.b32.xlu1 %v2316_v57, %s1964_s24  ;;  %1521 = vrot.lane.b32.xlu0 %v2241_v29, %s1964_s24 }
 0x1cb   :  { %862 = vmatpush.msra.mxu1 %v817_v14  ;;  %1523 = vrot.lane.b32.xlu2 %v2280_v62, %s1964_s24  ;;  %v809_v14 = vmul.f32 %v801_v36, %v2369_v48 }
 0x1cc   :  { %v2801_v49 = vpop.permute.xlu1 %455  ;;  %v2803_v38 = vpop.permute.xlu0 %447 }
 0x1cd   :  { %863 = vmatpush.msra.mxu1 %v813_v44  ;;  %v475_v48 = vsel %vm459_vm2, %v2801_v49, %v2686_v42  ;;  %v2813_v36 = vpop.permute.xlu2 %943  ;;  %v800_v42 = vperm.slane %v2743_v52, 0  ;;  %v490_v44 = vmul.f32 %v478_v11, %v2478_v7 }
 0x1ce   :  { %v498_v31 = vmul.f32 %v478_v11, %v475_v48 }
 0x1cf   :  { %864 = vmatpush.msra.mxu1 %v809_v14 }
 0x1d0   :  { %680 = vmatpush.msrb.mxu0 %v498_v31  ;;  %1907 = vmatmul.msk.f32.vlgmr.msra.gmra.mxu1 %vm581_vm6, %v2819_v19  ;;  %v2883_v31 = vld [vmem:[%s3319_s3 + $0xc] sm:$0xf] }
 0x1d1   :  { %1026 = vmatpush.msrb.mxu1 %v986_v46 }
 0x1d2   :  { %1692 = vrot.lane.b32.xlu1 %v2482_v9, %s1965_s15  ;;  %681 = vmatpush.msrb.mxu0 %v494_v4  ;;  %v565_v4 = vmul.f32 %v557_v61, %v2436_v30  ;;  %v480_v30 = vperm.slane %v2702_v10, 2 }
 0x1d3   :  { %1027 = vmatpush.msrb.mxu1 %v982_v40  ;;  %1668 = vrot.lane.b32.xlu0 %v2420_v23, %s1965_s15 }
 0x1d4   :  { %1515 = vrot.lane.b32.xlu2 %v2288_v1, %s1964_s24  ;;  %v526_v50 = vpop.permute.xlu1 %525  ;;  %v2834_v47 = vpop.permute.xlu0 %778  ;;  %682 = vmatpush.msrb.mxu0 %v490_v44  ;;  %v570_v44 = vmul.f32 %v558_v55, %v2512_v34  ;;  %v961_v34 = vsel %vm945_vm4, %v2813_v36, %v2761_v13 }
 0x1d5   :  { %1028 = vmatpush.msrb.mxu1 %v978_v63  ;;  %v539_v60 = vsel %vm535_vm3, %v526_v50, %v2726_v37  ;;  %v543_v39 = vsel %vm535_vm3, %v2688_v56, %v526_v50  ;;  %v796_v7 = vsel %vm780_vm5, %v2834_v47, %v2718_v53  ;;  %v2846_v14 = vpop.permute.xlu2 %1189  ;;  %v542_v37 = vsel %vm535_vm3, %v2540_v54, %v2645_v6 }
 0x1d6   :  { %v577_v0 = vmul.f32 %v557_v61, %v543_v39  ;;  %v578_v46 = vmul.f32 %v558_v55, %v539_v60  ;;  %v820_v48 = vmul.f32 %v800_v42, %v796_v7  ;;  %v538_v56 = vsel %vm535_vm3, %v2645_v6, %v2628_v2  ;;  %683 = vmatpush.msrb.mxu0 %v486_v43 }
 0x1d7   :  { %1029 = vmatpush.msrb.mxu1 %v974_v5  ;;  %v573_v53 = vmul.f32 %v557_v61, %v542_v37  ;;  %v2866_v54 = vperm.slane %v2861_v17, 1  ;;  %v816_v6 = vmul.f32 %v800_v42, %v2593_v51  ;;  %v574_v2 = vmul.f32 %v558_v55, %v538_v56  ;;  %1900 = vmatmul.msk.f32.vlgmr.msrb.gmra.mxu0 %vm581_vm6, %v2772_v24  ;;  %v3368_v56 = vld [vmem:[#allocation15_spill] sm:$0xff] }
 0x1d8   :  { %637 = vmatpush.msra.mxu2 %v577_v0  ;;  %657 = vmatpush.msra.mxu3 %v578_v46  ;;  %v1207_v11 = vsel %vm1199_vm7, %v2693_v18, %v2846_v14  ;;  %v569_v63 = vmul.f32 %v557_v61, %v2500_v22  ;;  %v812_v50 = vmul.f32 %v800_v42, %v2556_v33  ;;  %v3367_v46 = vld [vmem:[#allocation25_spill] sm:$0xff] }
 0x1d9   :  { %1115 = vmatpush.msra.mxu1 %v2422_v26  ;;  %841 = vmatpush.msra.mxu0 %v820_v48  ;;  %v467_v60 = vsel %vm459_vm2, %v2637_v45, %v2803_v38  ;;  %v1240_v39 = vmul.f32 %v2866_v54, %v1207_v11  ;;  %v463_v22 = vsel %vm459_vm2, %v2803_v38, %v2801_v49  ;;  %v481_v45 = vperm.slane %v2702_v10, 3  ;;  %v3371_v11 = vld [vmem:[#allocation16_spill] sm:$0xff] }
 0x1da   :  { %1684 = vrot.lane.b32.xlu1 %v2480_v8, %s1965_s15  ;;  %638 = vmatpush.msra.mxu2 %v573_v53  ;;  %v566_v61 = vmul.f32 %v558_v55, %v2432_v28  ;;  %v965_v49 = vperm.slane %v2777_v35, 0  ;;  %v808_v38 = vmul.f32 %v800_v42, %v2418_v21  ;;  %v500_v13 = vmul.f32 %v480_v30, %v467_v60  ;;  %v3366_v28 = vld [vmem:[#allocation23_spill] sm:$0xff]  ;;  %v3369_v53 = vld [vmem:[#allocation17_spill] sm:$0xff] }
 0x1db   :  { %1116 = vmatpush.msra.mxu1 %v2316_v57  ;;  %1666 = vrot.lane.b32.xlu0 %v2304_v12, %s1965_s15  ;;  %v501_v43 = vmul.f32 %v481_v45, %v463_v22  ;;  %v496_v10 = vmul.f32 %v480_v30, %v2585_v59  ;;  %v497_v48 = vmul.f32 %v481_v45, %v3367_v46  ;;  %v803_v22 = vperm.slane %v2743_v52, 3 }
 0x1dc   :  { %1513 = vrot.lane.b32.xlu2 %v2233_v25, %s1964_s24  ;;  %v2885_v51 = vpop.permute.xlu1 %935  ;;  %v2887_v40 = vpop.permute.xlu0 %1197  ;;  %658 = vmatpush.msra.mxu3 %v574_v2  ;;  %v985_v0 = vmul.f32 %v965_v49, %v961_v34  ;;  %v981_v55 = vmul.f32 %v965_v49, %v3366_v28  ;;  %v977_v59 = vmul.f32 %v965_v49, %v3368_v56  ;;  %v3370_v2 = vld [vmem:[#allocation3_spill] sm:$0xff]  ;;  %v3379_v28 = vld [vmem:[#allocation20_spill] sm:$0xff] }
 0x1dd   :  { %1117 = vmatpush.msra.mxu1 %v2256_v41  ;;  %842 = vmatpush.msra.mxu0 %v816_v6  ;;  %v2891_v5 = vpop.permute.xlu2 %1179  ;;  %v492_v6 = vmul.f32 %v480_v30, %v3369_v53  ;;  %v953_v46 = vsel %vm945_vm4, %v2763_v3, %v2885_v51  ;;  %v949_v56 = vsel %vm945_vm4, %v2885_v51, %v2813_v36  ;;  %v3381_v3 = vld [vmem:[#allocation8_spill] sm:$0xff]  ;;  %v3382_v53 = vld [vmem:[#allocation10_spill] sm:$0xff] }
 0x1de   :  { %1913 = vmatmul.msk.f32.vlgmr.msrb.gmra.mxu1 %vm581_vm6, %v2883_v31  ;;  %639 = vmatpush.msra.mxu2 %v569_v63  ;;  %v1206_v33 = vsel %vm1199_vm7, %v2891_v5, %v2620_v32  ;;  %v788_v63 = vsel %vm780_vm5, %v2716_v27, %v2765_v16  ;;  %v3373_v27 = vld [vmem:[#allocation9_spill] sm:$0xff] }
 0x1df   :  { %1118 = vmatpush.msra.mxu1 %v2219_v15  ;;  %659 = vmatpush.msra.mxu3 %v570_v44  ;;  %v1236_v7 = vmul.f32 %v2866_v54, %v1206_v33  ;;  %v784_v44 = vsel %vm780_vm5, %v2765_v16, %v2834_v47  ;;  %v489_v34 = vmul.f32 %v481_v45, %v3373_v27  ;;  %v3374_v33 = vld [vmem:[#allocation13_spill] sm:$0xff] }
 0x1e0   :  { %843 = vmatpush.msra.mxu0 %v812_v50  ;;  %640 = vmatpush.msra.mxu2 %v565_v4  ;;  %v493_v4 = vmul.f32 %v481_v45, %v3371_v11  ;;  %v3372_v50 = vld [vmem:[#allocation7_spill] sm:$0xff]  ;;  %v973_v16 = vmul.f32 %v965_v49, %v3374_v33  ;;  %v968_v11 = vperm.slane %v2777_v35, 3 }
 0x1e1   :  { %1280 = vmatpush.msrb.mxu1 %v1240_v39  ;;  %660 = vmatpush.msra.mxu3 %v566_v61  ;;  %v488_v60 = vmul.f32 %v480_v30, %v3372_v50  ;;  %v802_v39 = vperm.slane %v2743_v52, 2  ;;  %v823_v61 = vmul.f32 %v803_v22, %v784_v44  ;;  %v3384_v50 = vld [vmem:[#allocation24_spill] sm:$0xff] }
 0x1e2   :  { %844 = vmatpush.msra.mxu0 %v808_v38  ;;  %720 = vmatpush.msrb.mxu2 %v500_v13  ;;  %v3376_v13 = vld [vmem:[#allocation26_spill] sm:$0xff] }
 0x1e3   :  { %740 = vmatpush.msrb.mxu3 %v501_v43  ;;  %1281 = vmatpush.msrb.mxu1 %v1236_v7  ;;  %v822_v47 = vmul.f32 %v802_v39, %v788_v63  ;;  %v819_v45 = vmul.f32 %v803_v22, %v3376_v13  ;;  %v2971_v7 = vld [vmem:[%s3319_s3 + $0x10] sm:$0xf]  ;;  %v3377_v43 = vld [vmem:[#allocation2_spill] sm:$0xff]  ;;  %v3390_v13 = vld [vmem:[#allocation11_spill] sm:$0xff] }
 0x1e4   :  { %1006 = vmatpush.msrb.mxu0 %v985_v0  ;;  %v2926_v21 = vpop.permute.xlu1 %1191  ;;  %v2928_v42 = vpop.permute.xlu0 %1185  ;;  %721 = vmatpush.msrb.mxu2 %v496_v10  ;;  %v3378_v0 = vld [vmem:[#allocation18_spill] sm:$0xff] }
 0x1e5   :  { %v2930_v37 = vpop.permute.xlu2 %1362  ;;  %741 = vmatpush.msrb.mxu3 %v497_v48  ;;  %1664 = vrot.lane.b32.xlu1 %v3370_v2, %s1965_s15  ;;  %v814_v10 = vmul.f32 %v802_v39, %v3378_v0  ;;  %v1219_v48 = vperm.slane %v2861_v17, 0  ;;  %v3391_v0 = vld [vmem:[#allocation12_spill] sm:$0xff] }
 0x1e6   :  { %1007 = vmatpush.msrb.mxu0 %v981_v55  ;;  %1505 = vrot.lane.b32.xlu0 %v2219_v15, %s1964_s24  ;;  %v815_v55 = vmul.f32 %v803_v22, %v3379_v28  ;;  %v3392_v28 = vld [vmem:[#allocation4_spill] sm:$0xff] }
 0x1e7   :  { %1507 = vrot.lane.b32.xlu2 %v2256_v41, %s1964_s24  ;;  %1898 = vmatmul.msk.f32.vlgmr.msra.gmra.mxu2 %vm581_vm6, %v2734_v58 }
 0x1e8   :  { %1899 = vmatmul.msk.f32.vlgmr.msra.gmra.mxu3 %vm581_vm6, %v2734_v58  ;;  %722 = vmatpush.msrb.mxu2 %v492_v6  ;;  %v3375_v58 = vld [vmem:[#allocation27_spill] sm:$0xff]  ;;  %v811_v6 = vmul.f32 %v803_v22, %v3382_v53 }
 0x1e9   :  { %742 = vmatpush.msrb.mxu3 %v493_v4  ;;  %1008 = vmatpush.msrb.mxu0 %v977_v59  ;;  %v818_v38 = vmul.f32 %v802_v39, %v3375_v58  ;;  %v810_v59 = vmul.f32 %v802_v39, %v3381_v3  ;;  %v3383_v4 = vld [vmem:[#allocation31_spill] sm:$0xff]  ;;  %v3385_v39 = vld [vmem:[#allocation30_spill] sm:$0xff] }
 0x1ea   :  { %723 = vmatpush.msrb.mxu2 %v488_v60  ;;  %1906 = vmatmul.msk.f32.vlgmr.msra.gmra.mxu0 %vm581_vm6, %v2819_v19  ;;  %v1211_v63 = vsel %vm1199_vm7, %v3383_v4, %v2693_v18  ;;  %v1210_v60 = vsel %vm1199_vm7, %v3384_v50, %v2891_v5  ;;  %v3388_v5 = vld [vmem:[#allocation14_spill] sm:$0xff] }
 0x1eb   :  { %743 = vmatpush.msrb.mxu3 %v489_v34  ;;  %1009 = vmatpush.msrb.mxu0 %v973_v16  ;;  %v1239_v22 = vmul.f32 %v1219_v48, %v1211_v63  ;;  %v3387_v34 = vld [vmem:[#allocation22_spill] sm:$0xff]  ;;  %v1235_v16 = vmul.f32 %v1219_v48, %v1210_v60 }
 0x1ec   :  { %v2960_v30 = vpop.permute.xlu1 %1338  ;;  %v2962_v52 = vpop.permute.xlu0 %1183  ;;  %881 = vmatpush.msra.mxu2 %v822_v47  ;;  %1918 = vmatmul.msk.f32.vlgmr.msra.gmra.mxu1 %vm581_vm6, %v2971_v7 }
 0x1ed   :  { %901 = vmatpush.msra.mxu3 %v823_v61  ;;  %v2966_v49 = vpop.permute.xlu2 %1354  ;;  %1095 = vmatpush.msra.mxu0 %v2420_v23  ;;  %v3380_v23 = vld [vmem:[#allocation5_spill] sm:$0xff] }
 0x1ee   :  { %882 = vmatpush.msra.mxu2 %v818_v38  ;;  %1662 = vrot.lane.b32.xlu1 %v3377_v43, %s1965_s15  ;;  %v3389_v61 = vld [vmem:[#allocation21_spill] sm:$0xff]  ;;  %v1368_v60 = vsel %vm1364_vm8, %v2966_v49, %v2930_v37 }
 0x1ef   :  { %902 = vmatpush.msra.mxu3 %v819_v45  ;;  %1096 = vmatpush.msra.mxu0 %v2304_v12  ;;  %v967_v12 = vperm.slane %v2777_v35, 2  ;;  %v980_v58 = vmul.f32 %v968_v11, %v3389_v61 }
 0x1f0   :  { %1688 = vrot.lane.b32.xlu0 %v2280_v62, %s1965_s15  ;;  %1690 = vrot.lane.b32.xlu2 %v3380_v23, %s1965_s15 }
 0x1f1   :  { %1902 = vmatmul.msk.f32.vlgmr.msrb.gmra.mxu2 %vm581_vm6, %v2772_v24  ;;  %1903 = vmatmul.msk.f32.vlgmr.msrb.gmra.mxu3 %vm581_vm6, %v2772_v24  ;;  %v987_v36 = vmul.f32 %v967_v12, %v953_v46  ;;  %v988_v24 = vmul.f32 %v968_v11, %v949_v56  ;;  %v983_v18 = vmul.f32 %v967_v12, %v3385_v39  ;;  %v1827_v39 = vld [vmem:[%s3320_s4] sm:$0xf] }
 0x1f2   :  { %883 = vmatpush.msra.mxu2 %v814_v10  ;;  %903 = vmatpush.msra.mxu3 %v815_v55  ;;  %v979_v33 = vmul.f32 %v967_v12, %v3387_v34  ;;  %v975_v45 = vmul.f32 %v967_v12, %v3390_v13  ;;  %v976_v10 = vmul.f32 %v968_v11, %v3391_v0  ;;  %v3393_v12 = vld [vmem:[#allocation6_spill] sm:$0xff] }
 0x1f3   :  { %1097 = vmatpush.msra.mxu0 %v3370_v2  ;;  %v3386_v2 = vld [vmem:[#allocation29_spill] sm:$0xff] }
 0x1f4   :  { %v3007_v51 = vpop.permute.xlu1 %1336  ;;  %v1178_v44 = vpop.permute.xlu0 %1177  ;;  %884 = vmatpush.msra.mxu2 %v810_v59  ;;  %904 = vmatpush.msra.mxu3 %v811_v6  ;;  %v984_v27 = vmul.f32 %v968_v11, %v3386_v2  ;;  %v1203_v6 = vsel %vm1199_vm7, %v2846_v14, %v2887_v40  ;;  %v3394_v11 = vld [vmem:[#allocation28_spill] sm:$0xff] }
 0x1f5   :  { %v3013_v35 = vpop.permute.xlu2 %1334  ;;  %1098 = vmatpush.msra.mxu0 %v3377_v43  ;;  %v1209_v47 = vsel %vm1199_vm7, %v3388_v5, %v1178_v44  ;;  %v1205_v38 = vsel %vm1199_vm7, %v1178_v44, %v2928_v42  ;;  %v1202_v14 = vsel %vm1199_vm7, %v2620_v32, %v3394_v11 }
 0x1f6   :  { %1046 = vmatpush.msrb.mxu2 %v987_v36  ;;  %1912 = vmatmul.msk.f32.vlgmr.msrb.gmra.mxu0 %vm581_vm6, %v2883_v31  ;;  %v1231_v43 = vmul.f32 %v1219_v48, %v1209_v47  ;;  %v1232_v55 = vmul.f32 %v2866_v54, %v1205_v38 }
 0x1f7   :  { %1066 = vmatpush.msrb.mxu3 %v988_v24  ;;  %1260 = vmatpush.msrb.mxu0 %v1239_v22 }
 0x1f8   :  { %1047 = vmatpush.msrb.mxu2 %v983_v18  ;;  %1686 = vrot.lane.b32.xlu1 %v2241_v29, %s1965_s15 }
 0x1f9   :  { %1067 = vmatpush.msrb.mxu3 %v984_v27  ;;  %1261 = vmatpush.msrb.mxu0 %v1235_v16 }
 0x1fa   :  { %1048 = vmatpush.msrb.mxu2 %v979_v33  ;;  %1680 = vrot.lane.b32.xlu0 %v2288_v1, %s1965_s15 }
 0x1fb   :  { %1068 = vmatpush.msrb.mxu3 %v980_v58  ;;  %1682 = vrot.lane.b32.xlu2 %v3392_v28, %s1965_s15 }
 0x1fc   :  { %1908 = vmatmul.msk.f32.vlgmr.msra.gmra.mxu2 %vm581_vm6, %v2819_v19  ;;  %v1176_v46 = vpop.permute.xlu1 %1175  ;;  %v3039_v56 = vpop.permute.xlu0 %1360  ;;  %1909 = vmatmul.msk.f32.vlgmr.msra.gmra.mxu3 %vm581_vm6, %v2819_v19 }
 0x1fd   :  { %1049 = vmatpush.msrb.mxu2 %v975_v45  ;;  %v1208_v3 = vsel %vm1199_vm7, %v3393_v12, %v1176_v46  ;;  %v3046_v59 = vpop.permute.xlu2 %1332  ;;  %1069 = vmatpush.msrb.mxu3 %v976_v10  ;;  %v1204_v19 = vsel %vm1199_vm7, %v1176_v46, %v2962_v52  ;;  %v1379_v16 = vsel %vm1364_vm8, %v3039_v56, %v3007_v51 }
 0x1fe   :  { %v1227_v53 = vmul.f32 %v1219_v48, %v1208_v3  ;;  %1262 = vmatpush.msrb.mxu0 %v1231_v43  ;;  %1282 = vmatpush.msrb.mxu1 %v1232_v55  ;;  %v1222_v48 = vperm.slane %v2861_v17, 3 }
 0x1ff   :  { %1135 = vmatpush.msra.mxu2 %v2480_v8  ;;  %1155 = vmatpush.msra.mxu3 %v2482_v9  ;;  %v1221_v8 = vperm.slane %v2861_v17, 2  ;;  %v1215_v9 = vsel %vm1199_vm7, %v2887_v40, %v3383_v4  ;;  %v1927_v17 = vld [vmem:[%s3318_s5 + $0x18] sm:$0xf]  ;;  %v3395_v4 = vld [vmem:[#allocation19_spill] sm:$0xff] }
 0x200   :  { %1672 = vrot.lane.b32.xlu1 %v2256_v41, %s1965_s15  ;;  %1263 = vmatpush.msrb.mxu0 %v1227_v53  ;;  %v1214_v41 = vsel %vm1199_vm7, %v3394_v11, %v3384_v50  ;;  %v1213_v63 = vsel %vm1199_vm7, %v3395_v4, %v3388_v5  ;;  %v1386_v24 = vperm.slane %v1927_v17, 2  ;;  %v3133_v22 = vperm.slane %v1927_v17, 0 }
 0x201   :  { %1136 = vmatpush.msra.mxu2 %v3392_v28  ;;  %1156 = vmatpush.msra.mxu3 %v3380_v23  ;;  %v1241_v40 = vmul.f32 %v1221_v8, %v1203_v6  ;;  %v1237_v36 = vmul.f32 %v1221_v8, %v1202_v14  ;;  %v1238_v44 = vmul.f32 %v1222_v48, %v1214_v41  ;;  %v3135_v2 = vperm.slane %v1927_v17, 1 }
 0x202   :  { %1678 = vrot.lane.b32.xlu0 %v2233_v25, %s1965_s15  ;;  %1917 = vmatmul.msk.f32.vlgmr.msra.gmra.mxu0 %vm581_vm6, %v2971_v7  ;;  %v1406_v33 = vmul.f32 %v1386_v24, %v1368_v60 }
 0x203   :  { %1137 = vmatpush.msra.mxu2 %v2288_v1  ;;  %1157 = vmatpush.msra.mxu3 %v2280_v62  ;;  %v1228_v1 = vmul.f32 %v2866_v54, %v1204_v19  ;;  %v1242_v62 = vmul.f32 %v1222_v48, %v1215_v9  ;;  %v1201_v54 = vsel %vm1199_vm7, %v2928_v42, %v3395_v4  ;;  %v1928_v9 = vld [vmem:[%s3319_s3 + $0x18] sm:$0xf] }
 0x204   :  { %1676 = vrot.lane.b32.xlu2 %v2422_v26, %s1965_s15  ;;  %1914 = vmatmul.msk.f32.vlgmr.msrb.gmra.mxu2 %vm581_vm6, %v2883_v31  ;;  %v1359_v32 = vpop.permute.xlu1 %1358  ;;  %v3087_v23 = vpop.permute.xlu0 %1352  ;;  %v1212_v42 = vsel %vm1199_vm7, %v2926_v21, %v3393_v12  ;;  %v1233_v50 = vmul.f32 %v1221_v8, %v1201_v54 }
 0x205   :  { %1915 = vmatmul.msk.f32.vlgmr.msrb.gmra.mxu3 %vm581_vm6, %v2883_v31  ;;  %1138 = vmatpush.msra.mxu2 %v2233_v25  ;;  %v3097_v26 = vpop.permute.xlu2 %1356  ;;  %v1387_v31 = vperm.slane %v1927_v17, 3  ;;  %v1200_v25 = vsel %vm1199_vm7, %v2962_v52, %v2926_v21  ;;  %v1922_v21 = vld [vmem:[%s3319_s3 + $0x14] sm:$0xf]  ;;  %v1234_v52 = vmul.f32 %v1222_v48, %v1213_v63  ;;  %v1367_v18 = vsel %vm1364_vm8, %v3087_v23, %v3039_v56 }
 0x206   :  { %1158 = vmatpush.msra.mxu3 %v2241_v29  ;;  %1283 = vmatpush.msrb.mxu1 %v1228_v1  ;;  %v1380_v29 = vsel %vm1364_vm8, %v2930_v37, %v2960_v30  ;;  %v1229_v37 = vmul.f32 %v1221_v8, %v1200_v25  ;;  %v1230_v27 = vmul.f32 %v1222_v48, %v1212_v42  ;;  %v1933_v8 = vld [vmem:[%s3318_s5 + $0x1c] sm:$0xf] }
 0x207   :  { %1300 = vmatpush.msrb.mxu2 %v1241_v40  ;;  %1924 = vmatmul.msk.f32.vlgmr.msrb.gmra.mxu1 %vm581_vm6, %v1922_v21  ;;  %v1407_v34 = vmul.f32 %v1387_v31, %v1380_v29  ;;  %v1378_v5 = vsel %vm1364_vm8, %v1359_v32, %v3013_v35  ;;  %v1402_v47 = vmul.f32 %v1386_v24, %v1367_v18 }
 0x208   :  { %1320 = vmatpush.msrb.mxu3 %v1242_v62  ;;  %v1403_v28 = vmul.f32 %v1387_v31, %v1379_v16  ;;  %v1399_v55 = vmul.f32 %v1387_v31, %v1378_v5 }
 0x209   :  { %1301 = vmatpush.msrb.mxu2 %v1237_v36 }
 0x20a   :  { %1321 = vmatpush.msrb.mxu3 %v1238_v44  ;;  %1830 = vperm.xlu0 %1955, %v1827_v39  }
 0x20b   :  { %1302 = vmatpush.msrb.mxu2 %v1233_v50  ;;  %1923 = vmatmul.msk.f32.vlgmr.msrb.gmra.mxu0 %vm581_vm6, %v1922_v21 }
 0x20c   :  { %1322 = vmatpush.msrb.mxu3 %v1234_v52  ;;  %1674 = vrot.lane.b32.xlu2 %v2316_v57, %s1965_s15  ;;  %v1351_v61 = vpop.permute.xlu1 %1350  ;;  %v1347_v58 = vpop.permute.xlu0 %1346 }
 0x20d   :  { %1303 = vmatpush.msrb.mxu2 %v1229_v37  ;;  %v1366_v38 = vsel %vm1364_vm8, %v1351_v61, %v1359_v32  ;;  %v1372_v13 = vsel %vm1364_vm8, %v1347_v58, %v2966_v49  ;;  %v1376_v57 = vsel %vm1364_vm8, %v2960_v30, %v1347_v58  ;;  %v3156_v45 = vpop.permute.xlu2 %1503  ;;  %1920 = vmatmul.msk.f32.vlgmr.msra.gmra.mxu3 %vm581_vm6, %v2971_v7 }
 0x20e   :  { %1323 = vmatpush.msrb.mxu3 %v1230_v27  ;;  %1919 = vmatmul.msk.f32.vlgmr.msra.gmra.mxu2 %vm581_vm6, %v2971_v7  ;;  %v1398_v43 = vmul.f32 %v1386_v24, %v1366_v38  ;;  %v1404_v0 = vmul.f32 %v3133_v22, %v1376_v57  ;;  %v1405_v10 = vmul.f32 %v3135_v2, %v1372_v13 }
 0x20f   :  { %1465 = vmatpush.msra.mxu2 %v1406_v33  ;;  %v1377_v49 = vsel %vm1364_vm8, %v3097_v26, %v3046_v59 }
 0x210   :  { %1485 = vmatpush.msra.mxu3 %v1407_v34  ;;  %1425 = vmatpush.msra.mxu0 %v1404_v0  ;;  %v1395_v30 = vmul.f32 %v1387_v31, %v1377_v49  ;;  %v1934_v49 = vld [vmem:[%s3319_s3 + $0x1c] sm:$0xf] }
 0x211   :  { %1466 = vmatpush.msra.mxu2 %v1402_v47  ;;  %1445 = vmatpush.msra.mxu1 %v1405_v10 }
 0x212   :  { %1486 = vmatpush.msra.mxu3 %v1403_v28 }
 0x213   :  { %1467 = vmatpush.msra.mxu2 %v1398_v43 }
 0x214   :  { %1487 = vmatpush.msra.mxu3 %v1399_v55  ;;  %1670 = vrot.lane.b32.xlu2 %v2219_v15, %s1965_s15  ;;  %v1349_v7 = vpop.permute.xlu1 %1348  ;;  %v1345_v46 = vpop.permute.xlu0 %1344 }
 0x215   :  { %v1365_v56 = vsel %vm1364_vm8, %v1349_v7, %v3097_v26  ;;  %v1371_v12 = vsel %vm1364_vm8, %v1345_v46, %v3087_v23  ;;  %v1375_v3 = vsel %vm1364_vm8, %v3007_v51, %v1345_v46  ;;  %v3178_v53 = vpop.permute.xlu2 %1501  ;;  %1926 = vmatmul.msk.f32.vlgmr.msrb.gmra.mxu3 %vm581_vm6, %v1922_v21  ;;  %v3188_v51 = vperm.slane %v1933_v8, 3 }
 0x216   :  { %1488 = vmatpush.msra.mxu3 %v1395_v30  ;;  %1925 = vmatmul.msk.f32.vlgmr.msrb.gmra.mxu2 %vm581_vm6, %v1922_v21  ;;  %v1394_v15 = vmul.f32 %v1386_v24, %v1365_v56  ;;  %v1400_v19 = vmul.f32 %v3133_v22, %v1375_v3  ;;  %v1401_v6 = vmul.f32 %v3135_v2, %v1371_v12  ;;  %v1551_v26 = vperm.slane %v1933_v8, 2  ;;  %v1939_v30 = vld [vmem:[%s3318_s5 + $0x20] sm:$0xf] }
 0x217   :  { %v1717_v12 = vperm.slane %v1939_v30, 3 }
 0x218   :  { %1426 = vmatpush.msra.mxu0 %v1400_v19  ;;  %1446 = vmatpush.msra.mxu1 %v1401_v6 }
 0x219   :  { %1468 = vmatpush.msra.mxu2 %v1394_v15 }
 0x21c   :  { %v1343_v48 = vpop.permute.xlu1 %1342  ;;  %v1528_v11 = vpop.permute.xlu0 %1527 }
 0x21d   :  { %v1370_v14 = vsel %vm1364_vm8, %v1343_v48, %v1351_v61  ;;  %v1374_v41 = vsel %vm1364_vm8, %v3013_v35, %v1343_v48  ;;  %v1545_v1 = vsel %vm1529_vm9, %v1528_v11, %v3156_v45  ;;  %v1341_v40 = vpop.permute.xlu2 %1340  ;;  %1932 = vmatmul.msk.f32.vlgmr.msra.gmra.mxu3 %vm581_vm6, %v1928_v9 }
 0x21e   :  { %1931 = vmatmul.msk.f32.vlgmr.msra.gmra.mxu2 %vm581_vm6, %v1928_v9  ;;  %v1396_v17 = vmul.f32 %v3133_v22, %v1374_v41  ;;  %v1397_v32 = vmul.f32 %v3135_v2, %v1370_v14  ;;  %v1572_v23 = vmul.f32 %v3188_v51, %v1545_v1  ;;  %v1369_v62 = vsel %vm1364_vm8, %v1341_v40, %v1349_v7 }
 0x21f   :  { %v1373_v35 = vsel %vm1364_vm8, %v3046_v59, %v1341_v40  ;;  %v1393_v54 = vmul.f32 %v3135_v2, %v1369_v62  ;;  %v1550_v2 = vperm.slane %v1933_v8, 1 }
 0x220   :  { %v1392_v4 = vmul.f32 %v3133_v22, %v1373_v35  ;;  %1427 = vmatpush.msra.mxu0 %v1396_v17  ;;  %1447 = vmatpush.msra.mxu1 %v1397_v32  ;;  %v1549_v22 = vperm.slane %v1933_v8, 0 }
 0x221   :  { %1650 = vmatpush.msrb.mxu3 %v1572_v23 }
 0x222   :  { %1428 = vmatpush.msra.mxu0 %v1392_v4  ;;  %1448 = vmatpush.msra.mxu1 %v1393_v54 }
 0x223   :  { %1930 = vmatmul.msk.f32.vlgmr.msra.gmra.mxu1 %vm581_vm6, %v1928_v9  ;;  %1929 = vmatmul.msk.f32.vlgmr.msra.gmra.mxu0 %vm581_vm6, %v1928_v9 }
 0x224   :  { %v1526_v63 = vpop.permute.xlu1 %1525  ;;  %v1520_v36 = vpop.permute.xlu0 %1519 }
 0x225   :  { %v1544_v59 = vsel %vm1529_vm9, %v1526_v63, %v3178_v53  ;;  %v1533_v44 = vsel %vm1529_vm9, %v1520_v36, %v1528_v11  ;;  %v1524_v42 = vpop.permute.xlu2 %1523 }
 0x226   :  { %v1568_v31 = vmul.f32 %v3188_v51, %v1544_v59  ;;  %v1571_v25 = vmul.f32 %v1551_v26, %v1533_v44  ;;  %v1715_v59 = vperm.slane %v1939_v30, 1 }
 0x228   :  { %1630 = vmatpush.msrb.mxu2 %v1571_v25  ;;  %1651 = vmatpush.msrb.mxu3 %v1568_v31 }
 0x22c   :  { %v1518_v24 = vpop.permute.xlu1 %1517  ;;  %v1500_v50 = vpop.permute.xlu0 %1499 }
 0x22d   :  { %v1532_v29 = vsel %vm1529_vm9, %v1518_v24, %v1526_v63  ;;  %v1543_v60 = vsel %vm1529_vm9, %v1524_v42, %v1500_v50 }
 0x22e   :  { %v1567_v39 = vmul.f32 %v1551_v26, %v1532_v29  ;;  %v1564_v21 = vmul.f32 %v3188_v51, %v1543_v60  ;;  %v1516_v52 = vpop.permute.xlu2 %1515 }
 0x22f   :  { %v1531_v18 = vsel %vm1529_vm9, %v1516_v52, %v1524_v42 }
 0x230   :  { %v1563_v37 = vmul.f32 %v1551_v26, %v1531_v18  ;;  %1631 = vmatpush.msrb.mxu2 %v1567_v39  ;;  %1652 = vmatpush.msrb.mxu3 %v1564_v21 }
 0x232   :  { %1632 = vmatpush.msrb.mxu2 %v1563_v37 }
 0x234   :  { %v1512_v27 = vpop.permute.xlu1 %1511  ;;  %v1498_v16 = vpop.permute.xlu0 %1497 }
 0x235   :  { %v1537_v34 = vsel %vm1529_vm9, %v1512_v27, %v1520_v36  ;;  %v1541_v33 = vsel %vm1529_vm9, %v3156_v45, %v1512_v27  ;;  %v1714_v36 = vperm.slane %v1939_v30, 0 }
 0x236   :  { %v1569_v5 = vmul.f32 %v1549_v22, %v1541_v33  ;;  %v1570_v47 = vmul.f32 %v1550_v2, %v1537_v34  ;;  %v1514_v61 = vpop.permute.xlu2 %1513 }
 0x238   :  { %1590 = vmatpush.msrb.mxu0 %v1569_v5  ;;  %1610 = vmatpush.msrb.mxu1 %v1570_v47 }
 0x23c   :  { %v1510_v58 = vpop.permute.xlu1 %1509  ;;  %v1522_v57 = vpop.permute.xlu0 %1521 }
 0x23d   :  { %v1536_v38 = vsel %vm1529_vm9, %v1510_v58, %v1518_v24  ;;  %v1540_v13 = vsel %vm1529_vm9, %v3178_v53, %v1510_v58  ;;  %v1530_v45 = vsel %vm1529_vm9, %v1514_v61, %v1522_v57  ;;  %v1542_v10 = vsel %vm1529_vm9, %v1522_v57, %v1498_v16 }
 0x23e   :  { %v1565_v43 = vmul.f32 %v1549_v22, %v1540_v13  ;;  %v1566_v0 = vmul.f32 %v1550_v2, %v1536_v38  ;;  %v1559_v28 = vmul.f32 %v1551_v26, %v1530_v45  ;;  %v1560_v55 = vmul.f32 %v3188_v51, %v1542_v10 }
 0x23f   :  { %v3258_v51 = vperm.slane %v1939_v30, 2 }
 0x240   :  { %1591 = vmatpush.msrb.mxu0 %v1565_v43  ;;  %1611 = vmatpush.msrb.mxu1 %v1566_v0 }
 0x241   :  { %1633 = vmatpush.msrb.mxu2 %v1559_v28  ;;  %1653 = vmatpush.msrb.mxu3 %v1560_v55  ;;  %v1508_v7 = vpop.permute.xlu2 %1507 }
 0x242   :  { %1937 = vmatmul.msk.f32.vlgmr.msrb.gmra.mxu2 %vm581_vm6, %v1934_v49  ;;  %1938 = vmatmul.msk.f32.vlgmr.msrb.gmra.mxu3 %vm581_vm6, %v1934_v49  ;;  %v1535_v46 = vsel %vm1529_vm9, %v1508_v7, %v1516_v52  ;;  %v1539_v56 = vsel %vm1529_vm9, %v1500_v50, %v1508_v7 }
 0x243   :  { %v1561_v3 = vmul.f32 %v1549_v22, %v1539_v56  ;;  %v1562_v53 = vmul.f32 %v1550_v2, %v1535_v46  ;;  %v622_v46 = vpop.f32.mrf.mxu1 }
 0x244   :  { %v1693_v15 = vpop.permute.xlu1 %1692 }
 0x245   :  { %v1669_v19 = vpop.permute.xlu0 %1668  ;;  %1592 = vmatpush.msrb.mxu0 %v1561_v3  ;;  %1612 = vmatpush.msrb.mxu1 %v1562_v53 }
 0x246   :  { %v1710_v6 = vsel %vm1694_vm10, %v1693_v15, %v1669_v19  ;;  %v602_v56 = vpop.f32.mrf.mxu0 }
 0x247   :  { %v1737_v8 = vmul.f32 %v1717_v12, %v1710_v6 }
 0x249   :  { %1815 = vmatpush.msra.mxu3 %v1737_v8 }
 0x24a   :  { %v1691_v9 = vpop.permute.xlu2 %1690 }
 0x24b   :  { %v705_v3 = vpop.f32.mrf.mxu1 }
 0x24c   :  { %v1685_v48 = vpop.permute.xlu1 %1684 }
 0x24d   :  { %v1698_v11 = vsel %vm1694_vm10, %v1685_v48, %v1693_v15  ;;  %v1667_v14 = vpop.permute.xlu0 %1666 }
 0x24e   :  { %v1736_v41 = vmul.f32 %v3258_v51, %v1698_v11  ;;  %v1709_v1 = vsel %vm1694_vm10, %v1691_v9, %v1667_v14 }
 0x24f   :  { %v1733_v40 = vmul.f32 %v1717_v12, %v1709_v1 }
 0x250   :  { %1795 = vmatpush.msra.mxu2 %v1736_v41 }
 0x251   :  { %1816 = vmatpush.msra.mxu3 %v1733_v40 }
 0x253   :  { %v866_v6 = vpop.f32.mrf.mxu1 }
 0x254   :  { %v685_v53 = vpop.f32.mrf.mxu0 }
 0x255   :  { %v1683_v17 = vpop.permute.xlu2 %1682 }
 0x256   :  { %v1697_v32 = vsel %vm1694_vm10, %v1683_v17, %v1691_v9 }
 0x257   :  { %v1732_v23 = vmul.f32 %v3258_v51, %v1697_v32  ;;  %v1665_v62 = vpop.permute.xlu1 %1664 }
 0x258   :  { %v1506_v35 = vpop.permute.xlu0 %1505 }
 0x259   :  { %1796 = vmatpush.msra.mxu2 %v1732_v23  ;;  %v1534_v4 = vsel %vm1529_vm9, %v1506_v35, %v1514_v61  ;;  %v1538_v54 = vsel %vm1529_vm9, %v1498_v16, %v1506_v35  ;;  %v1940_v16 = vld [vmem:[%s3319_s3 + $0x20] sm:$0xf] }
 0x25a   :  { %v1557_v26 = vmul.f32 %v1549_v22, %v1538_v54  ;;  %v1558_v63 = vmul.f32 %v1550_v2, %v1534_v4  ;;  %v706_v4 = vadd.f32 %v705_v3, %v622_v46  ;;  %v686_v54 = vadd.f32 %v685_v53, %v602_v56 }
 0x25c   :  { %1593 = vmatpush.msrb.mxu0 %v1557_v26  ;;  %1613 = vmatpush.msrb.mxu1 %v1558_v63 }
 0x25d   :  { %1935 = vmatmul.msk.f32.vlgmr.msrb.gmra.mxu0 %vm581_vm6, %v1934_v49  ;;  %1936 = vmatmul.msk.f32.vlgmr.msrb.gmra.mxu1 %vm581_vm6, %v1934_v49 }
 0x25e   :  { %v1677_v44 = vpop.permute.xlu2 %1676 }
 0x25f   :  { %v1702_v42 = vsel %vm1694_vm10, %v1677_v44, %v1685_v48  ;;  %v1706_v31 = vsel %vm1694_vm10, %v1669_v19, %v1677_v44  ;;  %v1031_v48 = vpop.f32.mrf.mxu1 }
 0x260   :  { %v1734_v25 = vmul.f32 %v1714_v36, %v1706_v31  ;;  %v1735_v24 = vmul.f32 %v1715_v59, %v1702_v42  ;;  %v1663_v50 = vpop.permute.xlu1 %1662 }
 0x262   :  { %1755 = vmatpush.msra.mxu0 %v1734_v25  ;;  %1775 = vmatpush.msra.mxu1 %v1735_v24  ;;  %v1689_v29 = vpop.permute.xlu0 %1688 }
 0x263   :  { %v1708_v60 = vsel %vm1694_vm10, %v1689_v29, %v1665_v62 }
 0x264   :  { %v1729_v39 = vmul.f32 %v1717_v12, %v1708_v60 }
 0x266   :  { %v1675_v21 = vpop.permute.xlu2 %1674  ;;  %1817 = vmatpush.msra.mxu3 %v1729_v39 }
 0x267   :  { %v1701_v52 = vsel %vm1694_vm10, %v1675_v21, %v1683_v17  ;;  %v1705_v18 = vsel %vm1694_vm10, %v1667_v14, %v1675_v21  ;;  %v846_v8 = vpop.f32.mrf.mxu0 }
 0x268   :  { %v1730_v37 = vmul.f32 %v1714_v36, %v1705_v18  ;;  %v1731_v22 = vmul.f32 %v1715_v59, %v1701_v52  ;;  %v909_v44 = vadd.f32 %v846_v8, %v686_v54 }
 0x269   :  { %v1120_v1 = vpop.f32.mrf.mxu1 }
 0x26a   :  { %1756 = vmatpush.msra.mxu0 %v1730_v37  ;;  %1776 = vmatpush.msra.mxu1 %v1731_v22  ;;  %v1687_v2 = vpop.permute.xlu1 %1686  ;;  %v642_v20 = vpop.f32.mrf.mxu2 }
 0x26b   :  { %v1707_v27 = vsel %vm1694_vm10, %v1687_v2, %v1663_v50  ;;  %v662_v7 = vpop.f32.mrf.mxu3 }
 0x26c   :  { %v1725_v34 = vmul.f32 %v1717_v12, %v1707_v27  ;;  %v1681_v33 = vpop.permute.xlu0 %1680 }
 0x26d   :  { %v1696_v5 = vsel %vm1694_vm10, %v1681_v33, %v1689_v29 }
 0x26e   :  { %v1728_v47 = vmul.f32 %v3258_v51, %v1696_v5  ;;  %1818 = vmatpush.msra.mxu3 %v1725_v34  ;;  %v1671_v61 = vpop.permute.xlu2 %1670 }
 0x26f   :  { %1944 = vmatmul.msk.f32.vlgmr.msra.gmra.mxu3 %vm581_vm6, %v1940_v16  ;;  %v1703_v38 = vsel %vm1694_vm10, %v1663_v50, %v1671_v61 }
 0x270   :  { %1797 = vmatpush.msra.mxu2 %v1728_v47  ;;  %v1722_v55 = vmul.f32 %v1714_v36, %v1703_v38 }
 0x272   :  { %v1673_v58 = vpop.permute.xlu1 %1672 }
 0x273   :  { %v1700_v13 = vsel %vm1694_vm10, %v1673_v58, %v1681_v33  ;;  %v1704_v57 = vsel %vm1694_vm10, %v1665_v62, %v1673_v58  ;;  %v1011_v11 = vpop.f32.mrf.mxu0 }
 0x274   :  { %v1726_v43 = vmul.f32 %v1714_v36, %v1704_v57  ;;  %v1727_v0 = vmul.f32 %v1715_v59, %v1700_v13  ;;  %v1679_v45 = vpop.permute.xlu0 %1678  ;;  %v745_v12 = vpop.f32.mrf.mxu3  ;;  %v1074_v29 = vadd.f32 %v1011_v11, %v909_v44 }
 0x275   :  { %v1695_v10 = vsel %vm1694_vm10, %v1679_v45, %v1687_v2  ;;  %v1699_v28 = vsel %vm1694_vm10, %v1671_v61, %v1679_v45  ;;  %v725_v15 = vpop.f32.mrf.mxu2  ;;  %v746_v35 = vadd.f32 %v745_v12, %v662_v7 }
 0x276   :  { %v1724_v49 = vmul.f32 %v3258_v51, %v1695_v10  ;;  %1757 = vmatpush.msra.mxu0 %v1726_v43  ;;  %1777 = vmatpush.msra.mxu1 %v1727_v0  ;;  %v1723_v30 = vmul.f32 %v1715_v59, %v1699_v28  ;;  %v910_v59 = vadd.f32 %v866_v6, %v706_v4 }
 0x277   :  { %v726_v42 = vadd.f32 %v725_v15, %v642_v20 }
 0x278   :  { %1798 = vmatpush.msra.mxu2 %v1724_v49  ;;  %1758 = vmatpush.msra.mxu0 %v1722_v55  ;;  %v1075_v50 = vadd.f32 %v1031_v48, %v910_v59 }
 0x279   :  { %1943 = vmatmul.msk.f32.vlgmr.msra.gmra.mxu2 %vm581_vm6, %v1940_v16  ;;  %1778 = vmatpush.msra.mxu1 %v1723_v30 }
 0x27a   :  { %1941 = vmatmul.msk.f32.vlgmr.msra.gmra.mxu0 %vm581_vm6, %v1940_v16  ;;  %1942 = vmatmul.msk.f32.vlgmr.msra.gmra.mxu1 %vm581_vm6, %v1940_v16  ;;  %v1164_v52 = vadd.f32 %v1120_v1, %v1075_v50 }
 0x27c   :  { %v1831_v7 = vpop.permute.xlu0 %1830 }
 0x27f   :  { %v906_v19 = vpop.f32.mrf.mxu3  ;;  %v886_v51 = vpop.f32.mrf.mxu2 }
 0x280   :  { %v1100_v40 = vpop.f32.mrf.mxu0  ;;  %v912_v36 = vadd.f32 %v906_v19, %v746_v35  ;;  %v911_v60 = vadd.f32 %v886_v51, %v726_v42 }
 0x281   :  { %v1163_v18 = vadd.f32 %v1100_v40, %v1074_v29 }
 0x284   :  { %v1285_v23 = vpop.f32.mrf.mxu1 }
 0x285   :  { %v1329_v33 = vadd.f32 %v1285_v23, %v1164_v52 }
 0x287   :  { %v1051_v14 = vpop.f32.mrf.mxu2 }
 0x288   :  { %v1071_v9 = vpop.f32.mrf.mxu3  ;;  %v1265_v62 = vpop.f32.mrf.mxu0  ;;  %v1076_v22 = vadd.f32 %v1051_v14, %v911_v60 }
 0x289   :  { %v1077_v31 = vadd.f32 %v1071_v9, %v912_v36  ;;  %v1328_v16 = vadd.f32 %v1265_v62, %v1163_v18 }
 0x290   :  { %v1160_v41 = vpop.f32.mrf.mxu3 }
 0x291   :  { %v1140_v17 = vpop.f32.mrf.mxu2  ;;  %v1166_v21 = vadd.f32 %v1160_v41, %v1077_v31 }
 0x292   :  { %v1165_v5 = vadd.f32 %v1140_v17, %v1076_v22 }
 0x298   :  { %v1325_v32 = vpop.f32.mrf.mxu3 }
 0x299   :  { %v1305_v26 = vpop.f32.mrf.mxu2  ;;  %v1331_v2 = vadd.f32 %v1325_v32, %v1166_v21 }
 0x29a   :  { %v1330_v57 = vadd.f32 %v1305_v26, %v1165_v5 }
 0x2a0   :  { %v1490_v63 = vpop.f32.mrf.mxu3  ;;  %v1450_v25 = vpop.f32.mrf.mxu1 }
 0x2a1   :  { %v1430_v24 = vpop.f32.mrf.mxu0  ;;  %v1470_v39 = vpop.f32.mrf.mxu2  ;;  %v1496_v47 = vadd.f32 %v1490_v63, %v1331_v2  ;;  %v1494_v61 = vadd.f32 %v1450_v25, %v1329_v33 }
 0x2a2   :  { %v1493_v58 = vadd.f32 %v1430_v24, %v1328_v16  ;;  %v1495_v46 = vadd.f32 %v1470_v39, %v1330_v57 }
 0x2c5   :  { %v1655_v37 = vpop.f32.mrf.mxu3  ;;  %v1635_v38 = vpop.f32.mrf.mxu2 }
 0x2c6   :  { %v1661_v43 = vadd.f32 %v1655_v37, %v1496_v47  ;;  %v1660_v20 = vadd.f32 %v1635_v38, %v1495_v46 }
 0x2da   :  { %v1595_v27 = vpop.f32.mrf.mxu0  ;;  %v1615_v34 = vpop.f32.mrf.mxu1 }
 0x2db   :  { %v1658_v0 = vadd.f32 %v1595_v27, %v1493_v58  ;;  %v1659_v45 = vadd.f32 %v1615_v34, %v1494_v61 }
 0x2f2   :  { %v1820_v13 = vpop.f32.mrf.mxu3 }
 0x2f3   :  { %v1826_v10 = vadd.f32 %v1820_v13, %v1661_v43 }
 0x2f5   :  { %v1836_v12 = vadd.f32 %v1831_v7, %v1826_v10 }
 0x2f7   :  { %v1760_v28 = vpop.f32.mrf.mxu0  ;;  %v1780_v55 = vpop.f32.mrf.mxu1  ;;  %v1845_v8 = vrot.slane %v1836_v12, 4 }
 0x2f8   :  { %v1823_v49 = vadd.f32 %v1760_v28, %v1658_v0  ;;  %v1824_v30 = vadd.f32 %v1780_v55, %v1659_v45 }
 0x2fa   :  { %v1834_v56 = vadd.f32 %v1831_v7, %v1824_v30  ;;  %v1833_v3 = vadd.f32 %v1831_v7, %v1823_v49 }
 0x2fc   :  { %v1839_v53 = vrot.slane %v1834_v56, 4  ;;  %v1800_v15 = vpop.f32.mrf.mxu2 }
 0x2fd   :  { %v1825_v19 = vadd.f32 %v1800_v15, %v1660_v20 }
 0x2fe   :  { %v1840_v6 = vsel %vm104_vm0, %v1833_v3, %v1839_v53 }
 0x2ff   :  { %1842 = vst [vmem:[%s3321_s6] sm:$0xff] %v1840_v6  ;;  %v1835_v51 = vadd.f32 %v1831_v7, %v1825_v19 }
 0x301   :  { %v1846_v9 = vsel %vm104_vm0, %v1835_v51, %v1845_v8 }
 0x302   :  { %1945 = vst [vmem:[%s3321_s6 + $0x8] sm:$0xff] %v1846_v9 }

</bundles_post_ra>
